<compile_context>
chip_gen: v5e
topology: v5e:2x2
jax: 0.10.0
libtpu: 0.0.40
codegen_flags: <defaults>
</compile_context>

<pallas_src>
import functools

import jax
import jax.numpy as jnp
from jax.experimental import pallas as pl
from jax.experimental.pallas import tpu as pltpu


C1 = 64      # conv feature channels (lane axis of the conv matmuls)
NCLS = 10    # linear output classes
NPAD = 128   # lane-dense padded output width (10 -> 128)
K = 5        # conv kernel size
KK = K * K   # 25 taps
KKP = 32     # conv1 taps padded (25 -> 32) so 4 pooling corners pack into 128 lanes


def _round_up(v, m):
    return (v + m - 1) // m * m


# ----------------------------- fused Pallas kernel ----------------------------- #

def _fused_kernel(p_ref, w1_ref, w2c_ref, b_ref, out_ref, *, pb):
    """conv1 (MXU) -> 2x2 max pool (VPU) -> conv2+linear (MXU) for one batch block."""
    p = p_ref[0]                                    # (KK*pb, 128) lane-dense patches
    w1 = w1_ref[...]                                # (KKP, C1)

    # conv1: one matmul per pooling corner; lanes [c*32, c*32+25) hold that
    # corner's 5x5 patch (same conv1 weight for every corner).
    c0 = jnp.dot(p[:, 0 * KKP:1 * KKP], w1, preferred_element_type=jnp.float32)
    c1 = jnp.dot(p[:, 1 * KKP:2 * KKP], w1, preferred_element_type=jnp.float32)
    c2 = jnp.dot(p[:, 2 * KKP:3 * KKP], w1, preferred_element_type=jnp.float32)
    c3 = jnp.dot(p[:, 3 * KKP:4 * KKP], w1, preferred_element_type=jnp.float32)

    # 2x2 stride-2 max pooling == elementwise max over the 4 corner planes.
    pooled = jnp.maximum(jnp.maximum(c0, c1), jnp.maximum(c2, c3))   # (KK*pb, C1)

    # conv2 folded with nn.Linear: one matmul per conv2 tap.  Each LHS is a
    # contiguous, 8-aligned (pb, C1) slice; RHS is lane-dense (C1, 128).
    acc = jnp.dot(pooled[0:pb, :], w2c_ref[0], preferred_element_type=jnp.float32)
    for k in range(1, KK):
        acc = acc + jnp.dot(pooled[k * pb:(k + 1) * pb, :], w2c_ref[k],
                            preferred_element_type=jnp.float32)

    out_ref[0] = acc + b_ref[...]                   # (pb, 128) lane-dense store


# ------------------------------- wrapper / builder ------------------------------ #

def build_fused_forward(H, W, batch_block=16):
    """conv1(1->64,k5,valid) -> maxpool(2,2) -> [conv2(64->64,k5,valid) . Linear]."""
    assert (H - 4) % 2 == 0 and (W - 4) % 2 == 0
    H1, W1 = H - 4, W - 4            # conv1 output spatial
    P1, P2 = H1 // 2, W1 // 2        # pooled spatial
    O1, O2 = P1 - 4, P2 - 4          # conv2 / final output spatial
    assert O1 >= 1 and O2 >= 1
    NPOS = O1 * O2

    # Gather indices for the (corner, conv2-tap, out-pos, conv1-tap) ordered im2col.
    a_ = (jnp.arange(4) // 2).reshape(4, 1, 1, 1)
    b_ = (jnp.arange(4) % 2).reshape(4, 1, 1, 1)
    di = (jnp.arange(KK) // K).reshape(1, KK, 1, 1)
    dj = (jnp.arange(KK) % K).reshape(1, KK, 1, 1)
    oi = (jnp.arange(NPOS) // O2).reshape(1, 1, NPOS, 1)
    oj = (jnp.arange(NPOS) % O2).reshape(1, 1, NPOS, 1)
    ei = (jnp.arange(KK) // K).reshape(1, 1, 1, KK)
    ej = (jnp.arange(KK) % K).reshape(1, 1, 1, KK)
    rows = 2 * (oi + di) + a_ + ei                  # (4, KK, NPOS, KK), values in [0, H)
    cols = 2 * (oj + dj) + b_ + ej                  # (4, KK, NPOS, KK), values in [0, W)

    def forward(x_nchw, params):
        n = x_nchw.shape[0]
        bb = max(1, min(batch_block, -(-n // 2)))   # keep >= 2 grid steps (v7x megacore)
        g = -(-n // bb)
        npad = g * bb
        pb = _round_up(bb * NPOS, 8)                # 8-aligned rows per conv2 tap

        x = x_nchw[:, 0, :, :].astype(jnp.float32)  # (n, H, W)
        x = jnp.pad(x, ((0, npad - n), (0, 0), (0, 0)))

        # Lane-dense im2col:  row  = k2*pb + (b_local*NPOS + pos)
        #                     lane = corner*KKP + k1     (k1 in [0,25), rest zero)
        pt = x[:, rows, cols]                                   # (npad, 4, KK, NPOS, KK)
        pt = pt.reshape(g, bb, 4, KK, NPOS, KK)
        pt = jnp.transpose(pt, (0, 3, 1, 4, 2, 5))              # (g, KK, bb, NPOS, 4, KK)
        pt = pt.reshape(g, KK, bb * NPOS, 4, KK)
        pt = jnp.pad(pt, ((0, 0), (0, 0), (0, pb - bb * NPOS), (0, 0), (0, KKP - KK)))
        pt = pt.reshape(g, KK * pb, 4 * KKP)                    # (g, KK*pb, 128)

        # conv1 weight -> (KKP, 64), tap order k1 = ei*5 + ej, zero rows 25..31.
        w1 = jnp.transpose(params["conv1_w"], (2, 3, 1, 0)).reshape(KK, C1)
        w1 = jnp.pad(w1, ((0, KKP - KK), (0, 0)))
        # Fold conv2 with nn.Linear (exact, no nonlinearity in between):
        #   w2c[k2] = conv2_w[:, :, di, dj].T @ linear_w, padded to 128 lanes.
        w2 = jnp.transpose(params["conv2_w"], (2, 3, 1, 0)).reshape(KK, C1, C1)
        w2c = jnp.einsum("kio,on->kin", w2, params["linear_w"])  # (25, C1, 10)
        w2c = jnp.pad(w2c, ((0, 0), (0, 0), (0, NPAD - NCLS)))
        bias = jnp.pad(params["linear_b"], (0, NPAD - NCLS)).reshape(1, NPAD)

        out = pl.pallas_call(
            functools.partial(_fused_kernel, pb=pb),
            out_shape=jax.ShapeDtypeStruct((g, pb, NPAD), jnp.float32),
            grid=(g,),
            in_specs=[
                pl.BlockSpec((1, KK * pb, 4 * KKP), lambda i: (i, 0, 0)),
                pl.BlockSpec((KKP, C1), lambda i: (0, 0)),
                pl.BlockSpec((KK, C1, NPAD), lambda i: (0, 0, 0)),
                pl.BlockSpec((1, NPAD), lambda i: (0, 0)),
            ],
            out_specs=pl.BlockSpec((1, pb, NPAD), lambda i: (i, 0, 0)),
            compiler_params=pltpu.CompilerParams(
                dimension_semantics=("parallel",)),
        )(pt, w1, w2c, bias)

        out = out[:, :bb * NPOS, :NCLS].reshape(npad, NPOS, NCLS)[:n]
        return out.reshape(n, O1, O2, NCLS)          # per-location logits

    return forward


# ------------------------------ params / reference ----------------------------- #

def init_params(key):
    k1, k2, k3, k4 = jax.random.split(key, 4)
    return {
        "conv1_w": jax.random.normal(k1, (64, 1, 5, 5), jnp.float32) * 0.1,
        "conv2_w": jax.random.normal(k2, (64, 64, 5, 5), jnp.float32) * 0.02,
        "linear_w": jax.random.normal(k3, (64, 10), jnp.float32) * 0.05,
        "linear_b": jax.random.normal(k4, (10,), jnp.float32) * 0.01,
    }


def _conv2d_valid_ref(x, w_oihw):
    n, h, w, cin = x.shape
    cout, cin2, kh, kw = w_oihw.shape
    ho, wo = h - kh + 1, w - kw + 1
    cols = [x[:, di:di + ho, dj:dj + wo, :] for di in range(kh) for dj in range(kw)]
    patches = jnp.stack(cols, axis=3).reshape(n * ho * wo, kh * kw * cin)
    w_mat = jnp.transpose(w_oihw, (2, 3, 1, 0)).reshape(kh * kw * cin, cout)
    return (patches @ w_mat).reshape(n, ho, wo, cout)


def reference_forward(x_nchw, params):
    x = jnp.transpose(x_nchw, (0, 2, 3, 1))
    x = _conv2d_valid_ref(x, params["conv1_w"])
    n, h, w, c = x.shape
    x = x.reshape(n, h // 2, 2, w // 2, 2, c).max(axis=(2, 4))
    x = _conv2d_valid_ref(x, params["conv2_w"])
    n, h, w, c = x.shape
    x = x.reshape(n * h * w, c) @ params["linear_w"] + params["linear_b"]
    return x.reshape(n, h, w, NCLS)


# ----------------------------------- Main ----------------------------------- #

if __name__ == "__main__":
    key = jax.random.PRNGKey(0)
    pkey, xkey = jax.random.split(key)
    params = init_params(pkey)

    # Small dense "image" input, PyTorch NCHW convention: (N, C, H, W)
    x = jax.random.normal(xkey, (2, 1, 16, 16), jnp.float32)

    fwd = jax.jit(build_fused_forward(16, 16))
    out = jax.block_until_ready(fwd(x, params))
    assert out.shape == (2, 2, 2, 10), out.shape
    assert bool(jnp.all(jnp.isfinite(out)))

    ref = reference_forward(x, params)
    max_err = float(jnp.max(jnp.abs(out - ref)))
    assert max_err < 1e-3, f"mismatch vs reference: {max_err}"

    print("KERNEL_OK")
</pallas_src>

<mosaic_0001>
module attributes {stable_mosaic.version = 11 : i64} {
  func.func @_fused_kernel(%arg0: i32, %arg1: memref<1x200x128xf32, #tpu.memory_space<vmem>>, %arg2: memref<32x64xf32, #tpu.memory_space<vmem>>, %arg3: memref<25x64x128xf32, #tpu.memory_space<vmem>>, %arg4: memref<1x128xf32, #tpu.memory_space<vmem>>, %arg5: memref<1x8x128xf32, #tpu.memory_space<vmem>>) attributes {dimension_semantics = [#tpu.dimension_semantics<parallel>], iteration_bounds = array<i64: 2>, scalar_prefetch = 0 : i64, scratch_operands = 0 : i64, tpu.core_type = #tpu.core_type<tc>, window_params = [{transform_indices = @transform_0, window_bounds = array<i64: 1, 200, 128>}, {pipeline_mode = #tpu.pipeline_mode<synchronous>, transform_indices = @transform_1, window_bounds = array<i64: 32, 64>}, {pipeline_mode = #tpu.pipeline_mode<synchronous>, transform_indices = @transform_2, window_bounds = array<i64: 25, 64, 128>}, {pipeline_mode = #tpu.pipeline_mode<synchronous>, transform_indices = @transform_3, window_bounds = array<i64: 1, 128>}, {transform_indices = @transform_4, window_bounds = array<i64: 1, 8, 128>}]} {
    %c0 = arith.constant 0 : index
    %c0_0 = arith.constant 0 : index
    %c0_1 = arith.constant 0 : index
    %0 = vector.load %arg1[%c0, %c0_0, %c0_1] : memref<1x200x128xf32, #tpu.memory_space<vmem>>, vector<1x200x128xf32>
    %1 = vector.shape_cast %0 : vector<1x200x128xf32> to vector<200x128xf32>
    %c0_2 = arith.constant 0 : index
    %c0_3 = arith.constant 0 : index
    %2 = vector.load %arg2[%c0_2, %c0_3] : memref<32x64xf32, #tpu.memory_space<vmem>>, vector<32x64xf32>
    %3 = vector.extract_strided_slice %1 {offsets = [0, 0], sizes = [200, 32], strides = [1, 1]} : vector<200x128xf32> to vector<200x32xf32>
    %cst = arith.constant dense<0.000000e+00> : vector<200x64xf32>
    %4 = tpu.matmul %3, %2, %cst {dimension_numbers = #tpu.dot_dimension_numbers<[1], [0], [0], [1], [0, 0, 1, 1], [], []>} : vector<200x32xf32>, vector<32x64xf32>, vector<200x64xf32> -> vector<200x64xf32>
    %5 = vector.extract_strided_slice %1 {offsets = [0, 32], sizes = [200, 32], strides = [1, 1]} : vector<200x128xf32> to vector<200x32xf32>
    %cst_4 = arith.constant dense<0.000000e+00> : vector<200x64xf32>
    %6 = tpu.matmul %5, %2, %cst_4 {dimension_numbers = #tpu.dot_dimension_numbers<[1], [0], [0], [1], [0, 0, 1, 1], [], []>} : vector<200x32xf32>, vector<32x64xf32>, vector<200x64xf32> -> vector<200x64xf32>
    %7 = vector.extract_strided_slice %1 {offsets = [0, 64], sizes = [200, 32], strides = [1, 1]} : vector<200x128xf32> to vector<200x32xf32>
    %cst_5 = arith.constant dense<0.000000e+00> : vector<200x64xf32>
    %8 = tpu.matmul %7, %2, %cst_5 {dimension_numbers = #tpu.dot_dimension_numbers<[1], [0], [0], [1], [0, 0, 1, 1], [], []>} : vector<200x32xf32>, vector<32x64xf32>, vector<200x64xf32> -> vector<200x64xf32>
    %9 = vector.extract_strided_slice %1 {offsets = [0, 96], sizes = [200, 32], strides = [1, 1]} : vector<200x128xf32> to vector<200x32xf32>
    %cst_6 = arith.constant dense<0.000000e+00> : vector<200x64xf32>
    %10 = tpu.matmul %9, %2, %cst_6 {dimension_numbers = #tpu.dot_dimension_numbers<[1], [0], [0], [1], [0, 0, 1, 1], [], []>} : vector<200x32xf32>, vector<32x64xf32>, vector<200x64xf32> -> vector<200x64xf32>
    %11 = arith.maximumf %4, %6 : vector<200x64xf32>
    %12 = arith.maximumf %8, %10 : vector<200x64xf32>
    %13 = arith.maximumf %11, %12 : vector<200x64xf32>
    %14 = vector.extract_strided_slice %13 {offsets = [0, 0], sizes = [8, 64], strides = [1, 1]} : vector<200x64xf32> to vector<8x64xf32>
    %c0_7 = arith.constant 0 : index
    %c0_8 = arith.constant 0 : index
    %c0_9 = arith.constant 0 : index
    %15 = vector.load %arg3[%c0_7, %c0_8, %c0_9] : memref<25x64x128xf32, #tpu.memory_space<vmem>>, vector<1x64x128xf32>
    %16 = vector.shape_cast %15 : vector<1x64x128xf32> to vector<64x128xf32>
    %cst_10 = arith.constant dense<0.000000e+00> : vector<8x128xf32>
    %17 = tpu.matmul %14, %16, %cst_10 {dimension_numbers = #tpu.dot_dimension_numbers<[1], [0], [0], [1], [0, 0, 1, 1], [], []>} : vector<8x64xf32>, vector<64x128xf32>, vector<8x128xf32> -> vector<8x128xf32>
    %18 = vector.extract_strided_slice %13 {offsets = [8, 0], sizes = [8, 64], strides = [1, 1]} : vector<200x64xf32> to vector<8x64xf32>
    %c1 = arith.constant 1 : index
    %c0_11 = arith.constant 0 : index
    %c0_12 = arith.constant 0 : index
    %19 = vector.load %arg3[%c1, %c0_11, %c0_12] : memref<25x64x128xf32, #tpu.memory_space<vmem>>, vector<1x64x128xf32>
    %20 = vector.shape_cast %19 : vector<1x64x128xf32> to vector<64x128xf32>
    %cst_13 = arith.constant dense<0.000000e+00> : vector<8x128xf32>
    %21 = tpu.matmul %18, %20, %cst_13 {dimension_numbers = #tpu.dot_dimension_numbers<[1], [0], [0], [1], [0, 0, 1, 1], [], []>} : vector<8x64xf32>, vector<64x128xf32>, vector<8x128xf32> -> vector<8x128xf32>
    %22 = arith.addf %17, %21 : vector<8x128xf32>
    %23 = vector.extract_strided_slice %13 {offsets = [16, 0], sizes = [8, 64], strides = [1, 1]} : vector<200x64xf32> to vector<8x64xf32>
    %c2 = arith.constant 2 : index
    %c0_14 = arith.constant 0 : index
    %c0_15 = arith.constant 0 : index
    %24 = vector.load %arg3[%c2, %c0_14, %c0_15] : memref<25x64x128xf32, #tpu.memory_space<vmem>>, vector<1x64x128xf32>
    %25 = vector.shape_cast %24 : vector<1x64x128xf32> to vector<64x128xf32>
    %cst_16 = arith.constant dense<0.000000e+00> : vector<8x128xf32>
    %26 = tpu.matmul %23, %25, %cst_16 {dimension_numbers = #tpu.dot_dimension_numbers<[1], [0], [0], [1], [0, 0, 1, 1], [], []>} : vector<8x64xf32>, vector<64x128xf32>, vector<8x128xf32> -> vector<8x128xf32>
    %27 = arith.addf %22, %26 : vector<8x128xf32>
    %28 = vector.extract_strided_slice %13 {offsets = [24, 0], sizes = [8, 64], strides = [1, 1]} : vector<200x64xf32> to vector<8x64xf32>
    %c3 = arith.constant 3 : index
    %c0_17 = arith.constant 0 : index
    %c0_18 = arith.constant 0 : index
    %29 = vector.load %arg3[%c3, %c0_17, %c0_18] : memref<25x64x128xf32, #tpu.memory_space<vmem>>, vector<1x64x128xf32>
    %30 = vector.shape_cast %29 : vector<1x64x128xf32> to vector<64x128xf32>
    %cst_19 = arith.constant dense<0.000000e+00> : vector<8x128xf32>
    %31 = tpu.matmul %28, %30, %cst_19 {dimension_numbers = #tpu.dot_dimension_numbers<[1], [0], [0], [1], [0, 0, 1, 1], [], []>} : vector<8x64xf32>, vector<64x128xf32>, vector<8x128xf32> -> vector<8x128xf32>
    %32 = arith.addf %27, %31 : vector<8x128xf32>
    %33 = vector.extract_strided_slice %13 {offsets = [32, 0], sizes = [8, 64], strides = [1, 1]} : vector<200x64xf32> to vector<8x64xf32>
    %c4 = arith.constant 4 : index
    %c0_20 = arith.constant 0 : index
    %c0_21 = arith.constant 0 : index
    %34 = vector.load %arg3[%c4, %c0_20, %c0_21] : memref<25x64x128xf32, #tpu.memory_space<vmem>>, vector<1x64x128xf32>
    %35 = vector.shape_cast %34 : vector<1x64x128xf32> to vector<64x128xf32>
    %cst_22 = arith.constant dense<0.000000e+00> : vector<8x128xf32>
    %36 = tpu.matmul %33, %35, %cst_22 {dimension_numbers = #tpu.dot_dimension_numbers<[1], [0], [0], [1], [0, 0, 1, 1], [], []>} : vector<8x64xf32>, vector<64x128xf32>, vector<8x128xf32> -> vector<8x128xf32>
    %37 = arith.addf %32, %36 : vector<8x128xf32>
    %38 = vector.extract_strided_slice %13 {offsets = [40, 0], sizes = [8, 64], strides = [1, 1]} : vector<200x64xf32> to vector<8x64xf32>
    %c5 = arith.constant 5 : index
    %c0_23 = arith.constant 0 : index
    %c0_24 = arith.constant 0 : index
    %39 = vector.load %arg3[%c5, %c0_23, %c0_24] : memref<25x64x128xf32, #tpu.memory_space<vmem>>, vector<1x64x128xf32>
    %40 = vector.shape_cast %39 : vector<1x64x128xf32> to vector<64x128xf32>
    %cst_25 = arith.constant dense<0.000000e+00> : vector<8x128xf32>
    %41 = tpu.matmul %38, %40, %cst_25 {dimension_numbers = #tpu.dot_dimension_numbers<[1], [0], [0], [1], [0, 0, 1, 1], [], []>} : vector<8x64xf32>, vector<64x128xf32>, vector<8x128xf32> -> vector<8x128xf32>
    %42 = arith.addf %37, %41 : vector<8x128xf32>
    %43 = vector.extract_strided_slice %13 {offsets = [48, 0], sizes = [8, 64], strides = [1, 1]} : vector<200x64xf32> to vector<8x64xf32>
    %c6 = arith.constant 6 : index
    %c0_26 = arith.constant 0 : index
    %c0_27 = arith.constant 0 : index
    %44 = vector.load %arg3[%c6, %c0_26, %c0_27] : memref<25x64x128xf32, #tpu.memory_space<vmem>>, vector<1x64x128xf32>
    %45 = vector.shape_cast %44 : vector<1x64x128xf32> to vector<64x128xf32>
    %cst_28 = arith.constant dense<0.000000e+00> : vector<8x128xf32>
    %46 = tpu.matmul %43, %45, %cst_28 {dimension_numbers = #tpu.dot_dimension_numbers<[1], [0], [0], [1], [0, 0, 1, 1], [], []>} : vector<8x64xf32>, vector<64x128xf32>, vector<8x128xf32> -> vector<8x128xf32>
    %47 = arith.addf %42, %46 : vector<8x128xf32>
    %48 = vector.extract_strided_slice %13 {offsets = [56, 0], sizes = [8, 64], strides = [1, 1]} : vector<200x64xf32> to vector<8x64xf32>
    %c7 = arith.constant 7 : index
    %c0_29 = arith.constant 0 : index
    %c0_30 = arith.constant 0 : index
    %49 = vector.load %arg3[%c7, %c0_29, %c0_30] : memref<25x64x128xf32, #tpu.memory_space<vmem>>, vector<1x64x128xf32>
    %50 = vector.shape_cast %49 : vector<1x64x128xf32> to vector<64x128xf32>
    %cst_31 = arith.constant dense<0.000000e+00> : vector<8x128xf32>
    %51 = tpu.matmul %48, %50, %cst_31 {dimension_numbers = #tpu.dot_dimension_numbers<[1], [0], [0], [1], [0, 0, 1, 1], [], []>} : vector<8x64xf32>, vector<64x128xf32>, vector<8x128xf32> -> vector<8x128xf32>
    %52 = arith.addf %47, %51 : vector<8x128xf32>
    %53 = vector.extract_strided_slice %13 {offsets = [64, 0], sizes = [8, 64], strides = [1, 1]} : vector<200x64xf32> to vector<8x64xf32>
    %c8 = arith.constant 8 : index
    %c0_32 = arith.constant 0 : index
    %c0_33 = arith.constant 0 : index
    %54 = vector.load %arg3[%c8, %c0_32, %c0_33] : memref<25x64x128xf32, #tpu.memory_space<vmem>>, vector<1x64x128xf32>
    %55 = vector.shape_cast %54 : vector<1x64x128xf32> to vector<64x128xf32>
    %cst_34 = arith.constant dense<0.000000e+00> : vector<8x128xf32>
    %56 = tpu.matmul %53, %55, %cst_34 {dimension_numbers = #tpu.dot_dimension_numbers<[1], [0], [0], [1], [0, 0, 1, 1], [], []>} : vector<8x64xf32>, vector<64x128xf32>, vector<8x128xf32> -> vector<8x128xf32>
    %57 = arith.addf %52, %56 : vector<8x128xf32>
    %58 = vector.extract_strided_slice %13 {offsets = [72, 0], sizes = [8, 64], strides = [1, 1]} : vector<200x64xf32> to vector<8x64xf32>
    %c9 = arith.constant 9 : index
    %c0_35 = arith.constant 0 : index
    %c0_36 = arith.constant 0 : index
    %59 = vector.load %arg3[%c9, %c0_35, %c0_36] : memref<25x64x128xf32, #tpu.memory_space<vmem>>, vector<1x64x128xf32>
    %60 = vector.shape_cast %59 : vector<1x64x128xf32> to vector<64x128xf32>
    %cst_37 = arith.constant dense<0.000000e+00> : vector<8x128xf32>
    %61 = tpu.matmul %58, %60, %cst_37 {dimension_numbers = #tpu.dot_dimension_numbers<[1], [0], [0], [1], [0, 0, 1, 1], [], []>} : vector<8x64xf32>, vector<64x128xf32>, vector<8x128xf32> -> vector<8x128xf32>
    %62 = arith.addf %57, %61 : vector<8x128xf32>
    %63 = vector.extract_strided_slice %13 {offsets = [80, 0], sizes = [8, 64], strides = [1, 1]} : vector<200x64xf32> to vector<8x64xf32>
    %c10 = arith.constant 10 : index
    %c0_38 = arith.constant 0 : index
    %c0_39 = arith.constant 0 : index
    %64 = vector.load %arg3[%c10, %c0_38, %c0_39] : memref<25x64x128xf32, #tpu.memory_space<vmem>>, vector<1x64x128xf32>
    %65 = vector.shape_cast %64 : vector<1x64x128xf32> to vector<64x128xf32>
    %cst_40 = arith.constant dense<0.000000e+00> : vector<8x128xf32>
    %66 = tpu.matmul %63, %65, %cst_40 {dimension_numbers = #tpu.dot_dimension_numbers<[1], [0], [0], [1], [0, 0, 1, 1], [], []>} : vector<8x64xf32>, vector<64x128xf32>, vector<8x128xf32> -> vector<8x128xf32>
    %67 = arith.addf %62, %66 : vector<8x128xf32>
    %68 = vector.extract_strided_slice %13 {offsets = [88, 0], sizes = [8, 64], strides = [1, 1]} : vector<200x64xf32> to vector<8x64xf32>
    %c11 = arith.constant 11 : index
    %c0_41 = arith.constant 0 : index
    %c0_42 = arith.constant 0 : index
    %69 = vector.load %arg3[%c11, %c0_41, %c0_42] : memref<25x64x128xf32, #tpu.memory_space<vmem>>, vector<1x64x128xf32>
    %70 = vector.shape_cast %69 : vector<1x64x128xf32> to vector<64x128xf32>
    %cst_43 = arith.constant dense<0.000000e+00> : vector<8x128xf32>
    %71 = tpu.matmul %68, %70, %cst_43 {dimension_numbers = #tpu.dot_dimension_numbers<[1], [0], [0], [1], [0, 0, 1, 1], [], []>} : vector<8x64xf32>, vector<64x128xf32>, vector<8x128xf32> -> vector<8x128xf32>
    %72 = arith.addf %67, %71 : vector<8x128xf32>
    %73 = vector.extract_strided_slice %13 {offsets = [96, 0], sizes = [8, 64], strides = [1, 1]} : vector<200x64xf32> to vector<8x64xf32>
    %c12 = arith.constant 12 : index
    %c0_44 = arith.constant 0 : index
    %c0_45 = arith.constant 0 : index
    %74 = vector.load %arg3[%c12, %c0_44, %c0_45] : memref<25x64x128xf32, #tpu.memory_space<vmem>>, vector<1x64x128xf32>
    %75 = vector.shape_cast %74 : vector<1x64x128xf32> to vector<64x128xf32>
    %cst_46 = arith.constant dense<0.000000e+00> : vector<8x128xf32>
    %76 = tpu.matmul %73, %75, %cst_46 {dimension_numbers = #tpu.dot_dimension_numbers<[1], [0], [0], [1], [0, 0, 1, 1], [], []>} : vector<8x64xf32>, vector<64x128xf32>, vector<8x128xf32> -> vector<8x128xf32>
    %77 = arith.addf %72, %76 : vector<8x128xf32>
    %78 = vector.extract_strided_slice %13 {offsets = [104, 0], sizes = [8, 64], strides = [1, 1]} : vector<200x64xf32> to vector<8x64xf32>
    %c13 = arith.constant 13 : index
    %c0_47 = arith.constant 0 : index
    %c0_48 = arith.constant 0 : index
    %79 = vector.load %arg3[%c13, %c0_47, %c0_48] : memref<25x64x128xf32, #tpu.memory_space<vmem>>, vector<1x64x128xf32>
    %80 = vector.shape_cast %79 : vector<1x64x128xf32> to vector<64x128xf32>
    %cst_49 = arith.constant dense<0.000000e+00> : vector<8x128xf32>
    %81 = tpu.matmul %78, %80, %cst_49 {dimension_numbers = #tpu.dot_dimension_numbers<[1], [0], [0], [1], [0, 0, 1, 1], [], []>} : vector<8x64xf32>, vector<64x128xf32>, vector<8x128xf32> -> vector<8x128xf32>
    %82 = arith.addf %77, %81 : vector<8x128xf32>
    %83 = vector.extract_strided_slice %13 {offsets = [112, 0], sizes = [8, 64], strides = [1, 1]} : vector<200x64xf32> to vector<8x64xf32>
    %c14 = arith.constant 14 : index
    %c0_50 = arith.constant 0 : index
    %c0_51 = arith.constant 0 : index
    %84 = vector.load %arg3[%c14, %c0_50, %c0_51] : memref<25x64x128xf32, #tpu.memory_space<vmem>>, vector<1x64x128xf32>
    %85 = vector.shape_cast %84 : vector<1x64x128xf32> to vector<64x128xf32>
    %cst_52 = arith.constant dense<0.000000e+00> : vector<8x128xf32>
    %86 = tpu.matmul %83, %85, %cst_52 {dimension_numbers = #tpu.dot_dimension_numbers<[1], [0], [0], [1], [0, 0, 1, 1], [], []>} : vector<8x64xf32>, vector<64x128xf32>, vector<8x128xf32> -> vector<8x128xf32>
    %87 = arith.addf %82, %86 : vector<8x128xf32>
    %88 = vector.extract_strided_slice %13 {offsets = [120, 0], sizes = [8, 64], strides = [1, 1]} : vector<200x64xf32> to vector<8x64xf32>
    %c15 = arith.constant 15 : index
    %c0_53 = arith.constant 0 : index
    %c0_54 = arith.constant 0 : index
    %89 = vector.load %arg3[%c15, %c0_53, %c0_54] : memref<25x64x128xf32, #tpu.memory_space<vmem>>, vector<1x64x128xf32>
    %90 = vector.shape_cast %89 : vector<1x64x128xf32> to vector<64x128xf32>
    %cst_55 = arith.constant dense<0.000000e+00> : vector<8x128xf32>
    %91 = tpu.matmul %88, %90, %cst_55 {dimension_numbers = #tpu.dot_dimension_numbers<[1], [0], [0], [1], [0, 0, 1, 1], [], []>} : vector<8x64xf32>, vector<64x128xf32>, vector<8x128xf32> -> vector<8x128xf32>
    %92 = arith.addf %87, %91 : vector<8x128xf32>
    %93 = vector.extract_strided_slice %13 {offsets = [128, 0], sizes = [8, 64], strides = [1, 1]} : vector<200x64xf32> to vector<8x64xf32>
    %c16 = arith.constant 16 : index
    %c0_56 = arith.constant 0 : index
    %c0_57 = arith.constant 0 : index
    %94 = vector.load %arg3[%c16, %c0_56, %c0_57] : memref<25x64x128xf32, #tpu.memory_space<vmem>>, vector<1x64x128xf32>
    %95 = vector.shape_cast %94 : vector<1x64x128xf32> to vector<64x128xf32>
    %cst_58 = arith.constant dense<0.000000e+00> : vector<8x128xf32>
    %96 = tpu.matmul %93, %95, %cst_58 {dimension_numbers = #tpu.dot_dimension_numbers<[1], [0], [0], [1], [0, 0, 1, 1], [], []>} : vector<8x64xf32>, vector<64x128xf32>, vector<8x128xf32> -> vector<8x128xf32>
    %97 = arith.addf %92, %96 : vector<8x128xf32>
    %98 = vector.extract_strided_slice %13 {offsets = [136, 0], sizes = [8, 64], strides = [1, 1]} : vector<200x64xf32> to vector<8x64xf32>
    %c17 = arith.constant 17 : index
    %c0_59 = arith.constant 0 : index
    %c0_60 = arith.constant 0 : index
    %99 = vector.load %arg3[%c17, %c0_59, %c0_60] : memref<25x64x128xf32, #tpu.memory_space<vmem>>, vector<1x64x128xf32>
    %100 = vector.shape_cast %99 : vector<1x64x128xf32> to vector<64x128xf32>
    %cst_61 = arith.constant dense<0.000000e+00> : vector<8x128xf32>
    %101 = tpu.matmul %98, %100, %cst_61 {dimension_numbers = #tpu.dot_dimension_numbers<[1], [0], [0], [1], [0, 0, 1, 1], [], []>} : vector<8x64xf32>, vector<64x128xf32>, vector<8x128xf32> -> vector<8x128xf32>
    %102 = arith.addf %97, %101 : vector<8x128xf32>
    %103 = vector.extract_strided_slice %13 {offsets = [144, 0], sizes = [8, 64], strides = [1, 1]} : vector<200x64xf32> to vector<8x64xf32>
    %c18 = arith.constant 18 : index
    %c0_62 = arith.constant 0 : index
    %c0_63 = arith.constant 0 : index
    %104 = vector.load %arg3[%c18, %c0_62, %c0_63] : memref<25x64x128xf32, #tpu.memory_space<vmem>>, vector<1x64x128xf32>
    %105 = vector.shape_cast %104 : vector<1x64x128xf32> to vector<64x128xf32>
    %cst_64 = arith.constant dense<0.000000e+00> : vector<8x128xf32>
    %106 = tpu.matmul %103, %105, %cst_64 {dimension_numbers = #tpu.dot_dimension_numbers<[1], [0], [0], [1], [0, 0, 1, 1], [], []>} : vector<8x64xf32>, vector<64x128xf32>, vector<8x128xf32> -> vector<8x128xf32>
    %107 = arith.addf %102, %106 : vector<8x128xf32>
    %108 = vector.extract_strided_slice %13 {offsets = [152, 0], sizes = [8, 64], strides = [1, 1]} : vector<200x64xf32> to vector<8x64xf32>
    %c19 = arith.constant 19 : index
    %c0_65 = arith.constant 0 : index
    %c0_66 = arith.constant 0 : index
    %109 = vector.load %arg3[%c19, %c0_65, %c0_66] : memref<25x64x128xf32, #tpu.memory_space<vmem>>, vector<1x64x128xf32>
    %110 = vector.shape_cast %109 : vector<1x64x128xf32> to vector<64x128xf32>
    %cst_67 = arith.constant dense<0.000000e+00> : vector<8x128xf32>
    %111 = tpu.matmul %108, %110, %cst_67 {dimension_numbers = #tpu.dot_dimension_numbers<[1], [0], [0], [1], [0, 0, 1, 1], [], []>} : vector<8x64xf32>, vector<64x128xf32>, vector<8x128xf32> -> vector<8x128xf32>
    %112 = arith.addf %107, %111 : vector<8x128xf32>
    %113 = vector.extract_strided_slice %13 {offsets = [160, 0], sizes = [8, 64], strides = [1, 1]} : vector<200x64xf32> to vector<8x64xf32>
    %c20 = arith.constant 20 : index
    %c0_68 = arith.constant 0 : index
    %c0_69 = arith.constant 0 : index
    %114 = vector.load %arg3[%c20, %c0_68, %c0_69] : memref<25x64x128xf32, #tpu.memory_space<vmem>>, vector<1x64x128xf32>
    %115 = vector.shape_cast %114 : vector<1x64x128xf32> to vector<64x128xf32>
    %cst_70 = arith.constant dense<0.000000e+00> : vector<8x128xf32>
    %116 = tpu.matmul %113, %115, %cst_70 {dimension_numbers = #tpu.dot_dimension_numbers<[1], [0], [0], [1], [0, 0, 1, 1], [], []>} : vector<8x64xf32>, vector<64x128xf32>, vector<8x128xf32> -> vector<8x128xf32>
    %117 = arith.addf %112, %116 : vector<8x128xf32>
    %118 = vector.extract_strided_slice %13 {offsets = [168, 0], sizes = [8, 64], strides = [1, 1]} : vector<200x64xf32> to vector<8x64xf32>
    %c21 = arith.constant 21 : index
    %c0_71 = arith.constant 0 : index
    %c0_72 = arith.constant 0 : index
    %119 = vector.load %arg3[%c21, %c0_71, %c0_72] : memref<25x64x128xf32, #tpu.memory_space<vmem>>, vector<1x64x128xf32>
    %120 = vector.shape_cast %119 : vector<1x64x128xf32> to vector<64x128xf32>
    %cst_73 = arith.constant dense<0.000000e+00> : vector<8x128xf32>
    %121 = tpu.matmul %118, %120, %cst_73 {dimension_numbers = #tpu.dot_dimension_numbers<[1], [0], [0], [1], [0, 0, 1, 1], [], []>} : vector<8x64xf32>, vector<64x128xf32>, vector<8x128xf32> -> vector<8x128xf32>
    %122 = arith.addf %117, %121 : vector<8x128xf32>
    %123 = vector.extract_strided_slice %13 {offsets = [176, 0], sizes = [8, 64], strides = [1, 1]} : vector<200x64xf32> to vector<8x64xf32>
    %c22 = arith.constant 22 : index
    %c0_74 = arith.constant 0 : index
    %c0_75 = arith.constant 0 : index
    %124 = vector.load %arg3[%c22, %c0_74, %c0_75] : memref<25x64x128xf32, #tpu.memory_space<vmem>>, vector<1x64x128xf32>
    %125 = vector.shape_cast %124 : vector<1x64x128xf32> to vector<64x128xf32>
    %cst_76 = arith.constant dense<0.000000e+00> : vector<8x128xf32>
    %126 = tpu.matmul %123, %125, %cst_76 {dimension_numbers = #tpu.dot_dimension_numbers<[1], [0], [0], [1], [0, 0, 1, 1], [], []>} : vector<8x64xf32>, vector<64x128xf32>, vector<8x128xf32> -> vector<8x128xf32>
    %127 = arith.addf %122, %126 : vector<8x128xf32>
    %128 = vector.extract_strided_slice %13 {offsets = [184, 0], sizes = [8, 64], strides = [1, 1]} : vector<200x64xf32> to vector<8x64xf32>
    %c23 = arith.constant 23 : index
    %c0_77 = arith.constant 0 : index
    %c0_78 = arith.constant 0 : index
    %129 = vector.load %arg3[%c23, %c0_77, %c0_78] : memref<25x64x128xf32, #tpu.memory_space<vmem>>, vector<1x64x128xf32>
    %130 = vector.shape_cast %129 : vector<1x64x128xf32> to vector<64x128xf32>
    %cst_79 = arith.constant dense<0.000000e+00> : vector<8x128xf32>
    %131 = tpu.matmul %128, %130, %cst_79 {dimension_numbers = #tpu.dot_dimension_numbers<[1], [0], [0], [1], [0, 0, 1, 1], [], []>} : vector<8x64xf32>, vector<64x128xf32>, vector<8x128xf32> -> vector<8x128xf32>
    %132 = arith.addf %127, %131 : vector<8x128xf32>
    %133 = vector.extract_strided_slice %13 {offsets = [192, 0], sizes = [8, 64], strides = [1, 1]} : vector<200x64xf32> to vector<8x64xf32>
    %c24 = arith.constant 24 : index
    %c0_80 = arith.constant 0 : index
    %c0_81 = arith.constant 0 : index
    %134 = vector.load %arg3[%c24, %c0_80, %c0_81] : memref<25x64x128xf32, #tpu.memory_space<vmem>>, vector<1x64x128xf32>
    %135 = vector.shape_cast %134 : vector<1x64x128xf32> to vector<64x128xf32>
    %cst_82 = arith.constant dense<0.000000e+00> : vector<8x128xf32>
    %136 = tpu.matmul %133, %135, %cst_82 {dimension_numbers = #tpu.dot_dimension_numbers<[1], [0], [0], [1], [0, 0, 1, 1], [], []>} : vector<8x64xf32>, vector<64x128xf32>, vector<8x128xf32> -> vector<8x128xf32>
    %137 = arith.addf %132, %136 : vector<8x128xf32>
    %c0_83 = arith.constant 0 : index
    %c0_84 = arith.constant 0 : index
    %138 = vector.load %arg4[%c0_83, %c0_84] : memref<1x128xf32, #tpu.memory_space<vmem>>, vector<1x128xf32>
    %139 = vector.broadcast %138 : vector<1x128xf32> to vector<8x128xf32>
    %140 = arith.addf %137, %139 : vector<8x128xf32>
    %c0_85 = arith.constant 0 : index
    %c0_86 = arith.constant 0 : index
    %c0_87 = arith.constant 0 : index
    %141 = vector.load %arg5[%c0_85, %c0_86, %c0_87] : memref<1x8x128xf32, #tpu.memory_space<vmem>>, vector<1x8x128xf32>
    %142 = vector.shape_cast %141 : vector<1x8x128xf32> to vector<8x128xf32>
    %143 = vector.shape_cast %140 : vector<8x128xf32> to vector<1x8x128xf32>
    tpu.vector_store %arg5[%c0_85, %c0_86, %c0_87], %143 {strides = array<i32>} : memref<1x8x128xf32, #tpu.memory_space<vmem>>, vector<1x8x128xf32>,
    return
  }
  func.func @transform_0(%arg0: i32) -> (i32, i32, i32) {
    %c0_i32 = arith.constant 0 : i32
    %c0_i32_0 = arith.constant 0 : i32
    %c0_i32_1 = arith.constant 0 : i32
    return %arg0, %c0_i32, %c0_i32_0 : i32, i32, i32
  }
  func.func @transform_1(%arg0: i32) -> (i32, i32) {
    %c0_i32 = arith.constant 0 : i32
    %c0_i32_0 = arith.constant 0 : i32
    %c0_i32_1 = arith.constant 0 : i32
    return %c0_i32, %c0_i32_0 : i32, i32
  }
  func.func @transform_2(%arg0: i32) -> (i32, i32, i32) {
    %c0_i32 = arith.constant 0 : i32
    %c0_i32_0 = arith.constant 0 : i32
    %c0_i32_1 = arith.constant 0 : i32
    %c0_i32_2 = arith.constant 0 : i32
    return %c0_i32, %c0_i32_0, %c0_i32_1 : i32, i32, i32
  }
  func.func @transform_3(%arg0: i32) -> (i32, i32) {
    %c0_i32 = arith.constant 0 : i32
    %c0_i32_0 = arith.constant 0 : i32
    %c0_i32_1 = arith.constant 0 : i32
    return %c0_i32, %c0_i32_0 : i32, i32
  }
  func.func @transform_4(%arg0: i32) -> (i32, i32, i32) {
    %c0_i32 = arith.constant 0 : i32
    %c0_i32_0 = arith.constant 0 : i32
    %c0_i32_1 = arith.constant 0 : i32
    return %arg0, %c0_i32, %c0_i32_0 : i32, i32, i32
  }
}

</mosaic_0001>

<bundles_post_ra>
// kernel: forward.1
= control target key start
LH: loop header
LB: loop body
LE: loop exit
PB: predicated region body
PF: predicated region fallthrough
CT: control target
= control target key end

     0   :  { %s2305_s15 = smov 0   ;;  %s3339_s0 = inlined_call_operand.vmem [shape: f32[2,200,128], index: 0, kind: input, shape index: {}]   ;;  %s3340_s1 = inlined_call_operand.vmem [shape: f32[32,64], index: 1, kind: input, shape index: {}]   ;;  %s3341_s2 = inlined_call_operand.vmem [shape: f32[25,64,128], index: 2, kind: input, shape index: {}]   ;;  %s3342_s3 = inlined_call_operand.vmem [shape: f32[1,128], index: 3, kind: input, shape index: {}]   ;;  %s3343_s4 = inlined_call_operand.vmem [shape: f32[2,8,128], index: 4, kind: output, shape index: {}]  }
   0x1 LB: > { %s1926_s16 = sadd.s32 4294967295, %s2275_s15   ;;  %p1930_p0 = scmp.ge.s32.totalorder %s2275_s15, 1  ;;  %s2275_s15 = sphi %s2305_s15, %s14_s15  }
   0x2   : > { %p162_p1 = scmp.lt.s32.totalorder %s2275_s15, 3 }
   0x4   : > { %p163_p2 = pnand %p1930_p0, %p162_p1 }
   0x5   : > { %p187_p3 = scmp.lt.s32.totalorder (!%p163_p2), %s1926_s16, 1  ;;  %s2277_s21 = smov (!%p163_p2), 96  }
   0x6   : > { %166 = sbr.rel (%p163_p2) target bundleno = 599 (0x257), region = 36  ;;  %s2278_s22 = smov (!%p163_p2), 64  }
   0x7   : > { %s2279_s23 = smov (!%p163_p2), 32  }
   0xb   : > { %s3345_s16 = smov (!%p187_p3, %s1926_s16), 1  ;;  %v224_v5 = vld [vmem:[%s3340_s1 + $0x18] sm:$0xff]  ;;  %v223_v6 = vld [vmem:[%s3340_s1 + $0x10] sm:$0xff]  ;;  %v222_v7 = vld [vmem:[%s3340_s1 + $0x8] sm:$0xff]  ;;  %vm225_vm0 = vcmask 261120   ;;  %vm1061_vm1 = vcmask 523264  }
   0xc   : > { %s2256_s17 = smul.u32 200, %s3345_s16  ;;  %313 = vmatpush.msra.mxu0 %v224_v5  ;;  %2252 = vmatpush.msra.mxu1 %v224_v5  ;;  %v221_v9 = vld [vmem:[%s3340_s1] sm:$0xff]  ;;  %v2050_v50 = vld [vmem:[%s3341_s2 + $0xb8] sm:$0xff]  ;;  %s1932_s24 = sshll.u32 %s3345_s16, 3 }
   0xd   : > { %697 = vmatpush.msra.mxu2 %v224_v5  ;;  %889 = vmatpush.msra.mxu3 %v224_v5  ;;  %v2059_v55 = vld [vmem:[%s3341_s2 + $0xf8] sm:$0xff]  ;;  %s195_s29 = scalar_lea.vmem %s3343_s4, %s1932_s24 }
   0xe   : > { %s2319_s20 = scalar_lea.vmem %s3339_s0, %s2256_s17  ;;  %314 = vmatpush.msra.mxu0 %v223_v6  ;;  %2253 = vmatpush.msra.mxu1 %v223_v6  ;;  %v1051_v56 = vld [vmem:[%s3341_s2 + $0x38] sm:$0xff] }
   0xf   : > { %v196_v0 = vld [vmem:[%s2319_s20] sm:$0xff]  ;;  %v197_v1 = vld [vmem:[%s2319_s20 + $0x8] sm:$0xff]  ;;  %v198_v2 = vld [vmem:[%s2319_s20 + $0x10] sm:$0xff]  ;;  %698 = vmatpush.msra.mxu2 %v223_v6  ;;  %890 = vmatpush.msra.mxu3 %v223_v6 }
  0x10   : > { %393 = vrot.lane.b32.xlu1 %v196_v0, %s2277_s21  ;;  %585 = vrot.lane.b32.xlu0 %v196_v0, %s2278_s22  ;;  %v199_v3 = vld [vmem:[%s2319_s20 + $0x18] sm:$0xff]  ;;  %v200_v4 = vld [vmem:[%s2319_s20 + $0x20] sm:$0xff] }
  0x11   : > { %779 = vrot.lane.b32.xlu2 %v197_v1, %s2279_s23  ;;  %v201_v8 = vld [vmem:[%s2319_s20 + $0x28] sm:$0xff]  ;;  %315 = vmatpush.msra.mxu0 %v222_v7  ;;  %v202_v10 = vld [vmem:[%s2319_s20 + $0x30] sm:$0xff]  ;;  %v203_v11 = vld [vmem:[%s2319_s20 + $0x38] sm:$0xff] }
  0x12   : > { %2254 = vmatpush.msra.mxu1 %v222_v7  ;;  %699 = vmatpush.msra.mxu2 %v222_v7  ;;  %v204_v12 = vld [vmem:[%s2319_s20 + $0x40] sm:$0xff]  ;;  %v205_v13 = vld [vmem:[%s2319_s20 + $0x48] sm:$0xff]  ;;  %v206_v15 = vld [vmem:[%s2319_s20 + $0x50] sm:$0xff] }
  0x13   : > { %891 = vmatpush.msra.mxu3 %v222_v7  ;;  %316 = vmatpush.msra.mxu0 %v221_v9  ;;  %v2377_v14 = vld [vmem:[%s2319_s20 + $0xc0] sm:$0xff]  ;;  %v207_v16 = vld [vmem:[%s2319_s20 + $0x58] sm:$0xff]  ;;  %v209_v20 = vld [vmem:[%s2319_s20 + $0x68] sm:$0xff] }
  0x14   : > { %1933 = vmatmul.msk.f32.vlgmr.msra.gmra.mxu0 %vm225_vm0, %v196_v0  ;;  %2255 = vmatpush.msra.mxu1 %v221_v9  ;;  %v208_v18 = vld [vmem:[%s2319_s20 + $0x60] sm:$0xff]  ;;  %v210_v22 = vld [vmem:[%s2319_s20 + $0x70] sm:$0xff]  ;;  %v211_v26 = vld [vmem:[%s2319_s20 + $0x78] sm:$0xff] }
  0x15   : > { %700 = vmatpush.msra.mxu2 %v221_v9  ;;  %892 = vmatpush.msra.mxu3 %v221_v9  ;;  %v2419_v30 = vld [vmem:[%s2319_s20 + $0x80] sm:$0xff]  ;;  %v2432_v34 = vld [vmem:[%s2319_s20 + $0x88] sm:$0xff]  ;;  %v2445_v38 = vld [vmem:[%s2319_s20 + $0x90] sm:$0xff] }
  0x16   : > { %505 = vmatpush.msrb.mxu1 %v224_v5  ;;  %v2458_v42 = vld [vmem:[%s2319_s20 + $0x98] sm:$0xff]  ;;  %v2471_v46 = vld [vmem:[%s2319_s20 + $0xa0] sm:$0xff]  ;;  %v2487_v51 = vld [vmem:[%s2319_s20 + $0xa8] sm:$0xff] }
  0x17   : > { %1957 = vmatmul.msk.f32.vlgmr.msra.gmra.mxu1 %vm225_vm0, %v2377_v14  ;;  %1128 = vmatpush.msrb.mxu2 %v2050_v50  ;;  %v218_v57 = vld [vmem:[%s2319_s20 + $0xb0] sm:$0xff]  ;;  %v2040_v61 = vld [vmem:[%s3341_s2 + $0x78] sm:$0xff]  ;;  %v2056_v50 = vld [vmem:[%s3341_s2 + $0xe0] sm:$0xff] }
  0x18   : > { %587 = vrot.lane.b32.xlu1 %v197_v1, %s2278_s22  ;;  %777 = vrot.lane.b32.xlu0 %v196_v0, %s2279_s23  ;;  %v2519_v62 = vld [vmem:[%s2319_s20 + $0xb8] sm:$0xff] }
  0x19   : > { %395 = vrot.lane.b32.xlu2 %v197_v1, %s2277_s21  ;;  %506 = vmatpush.msrb.mxu1 %v223_v6  ;;  %v2058_v6 = vld [vmem:[%s3341_s2 + $0xf0] sm:$0xff] }
  0x1a   : > { %1161 = vmatpush.msrb.mxu3 %v2059_v55  ;;  %1073 = vmatpush.msrb.mxu0 %v2040_v61 }
  0x1b   : > { %507 = vmatpush.msrb.mxu1 %v222_v7  ;;  %v1050_v7 = vld [vmem:[%s3341_s2 + $0x30] sm:$0xff] }
  0x1c   : > { %1934 = vmatmul.msk.f32.gmra.mxu0 %vm225_vm0, %v197_v1  ;;  %1162 = vmatpush.msrb.mxu3 %v2058_v6 }
  0x1d   : > { %508 = vmatpush.msrb.mxu1 %v221_v9 }
  0x1f   : > { %1096 = vmatpush.msra.mxu1 %v1051_v56  ;;  %v2063_v56 = vld [vmem:[%s3341_s2 + $0x110] sm:$0xff] }
  0x20   : > { %589 = vrot.lane.b32.xlu0 %v198_v2, %s2278_s22  ;;  %781 = vrot.lane.b32.xlu1 %v198_v2, %s2279_s23 }
  0x21   : > { %397 = vrot.lane.b32.xlu2 %v198_v2, %s2277_s21  ;;  %1097 = vmatpush.msra.mxu1 %v1050_v7  ;;  %v1046_v7 = vld [vmem:[%s3341_s2 + $0x10] sm:$0xff] }
  0x24   : > { %1935 = vmatmul.msk.f32.gmra.mxu0 %vm225_vm0, %v198_v2  ;;  %v2049_v2 = vld [vmem:[%s3341_s2 + $0xb0] sm:$0xff] }
  0x25   : > { %1129 = vmatpush.msrb.mxu2 %v2049_v2  ;;  %v1047_v2 = vld [vmem:[%s3341_s2 + $0x18] sm:$0xff] }
  0x28   : > { %591 = vrot.lane.b32.xlu0 %v199_v3, %s2278_s22  ;;  %783 = vrot.lane.b32.xlu1 %v199_v3, %s2279_s23 }
  0x29   : > { %399 = vrot.lane.b32.xlu2 %v199_v3, %s2277_s21 }
  0x2c   : > { %1936 = vmatmul.msk.f32.gmra.mxu0 %vm225_vm0, %v199_v3 }
  0x30   : > { %593 = vrot.lane.b32.xlu0 %v200_v4, %s2278_s22  ;;  %785 = vrot.lane.b32.xlu1 %v200_v4, %s2279_s23 }
  0x31   : > { %401 = vrot.lane.b32.xlu2 %v200_v4, %s2277_s21 }
  0x34   : > { %1937 = vmatmul.msk.f32.gmra.mxu0 %vm225_vm0, %v200_v4 }
  0x38   : > { %595 = vrot.lane.b32.xlu0 %v201_v8, %s2278_s22  ;;  %787 = vrot.lane.b32.xlu1 %v201_v8, %s2279_s23 }
  0x39   : > { %403 = vrot.lane.b32.xlu2 %v201_v8, %s2277_s21 }
  0x3c   : > { %1938 = vmatmul.msk.f32.gmra.mxu0 %vm225_vm0, %v201_v8 }
  0x40   : > { %597 = vrot.lane.b32.xlu0 %v202_v10, %s2278_s22  ;;  %789 = vrot.lane.b32.xlu1 %v202_v10, %s2279_s23 }
  0x41   : > { %405 = vrot.lane.b32.xlu2 %v202_v10, %s2277_s21 }
  0x44   : > { %1939 = vmatmul.msk.f32.gmra.mxu0 %vm225_vm0, %v202_v10 }
  0x48   : > { %599 = vrot.lane.b32.xlu0 %v203_v11, %s2278_s22  ;;  %791 = vrot.lane.b32.xlu1 %v203_v11, %s2279_s23 }
  0x49   : > { %407 = vrot.lane.b32.xlu2 %v203_v11, %s2277_s21 }
  0x4c   : > { %1940 = vmatmul.msk.f32.gmra.mxu0 %vm225_vm0, %v203_v11  ;;  %v2039_v11 = vld [vmem:[%s3341_s2 + $0x70] sm:$0xff] }
  0x4d   : > { %1074 = vmatpush.msrb.mxu0 %v2039_v11 }
  0x50   : > { %601 = vrot.lane.b32.xlu0 %v204_v12, %s2278_s22  ;;  %793 = vrot.lane.b32.xlu1 %v204_v12, %s2279_s23 }
  0x51   : > { %409 = vrot.lane.b32.xlu2 %v204_v12, %s2277_s21 }
  0x54   : > { %1941 = vmatmul.msk.f32.gmra.mxu0 %vm225_vm0, %v204_v12 }
  0x58   : > { %603 = vrot.lane.b32.xlu0 %v205_v13, %s2278_s22  ;;  %795 = vrot.lane.b32.xlu1 %v205_v13, %s2279_s23 }
  0x59   : > { %411 = vrot.lane.b32.xlu2 %v205_v13, %s2277_s21 }
  0x5c   : > { %1942 = vmatmul.msk.f32.gmra.mxu0 %vm225_vm0, %v205_v13 }
  0x60   : > { %605 = vrot.lane.b32.xlu0 %v206_v15, %s2278_s22  ;;  %797 = vrot.lane.b32.xlu1 %v206_v15, %s2279_s23 }
  0x61   : > { %413 = vrot.lane.b32.xlu2 %v206_v15, %s2277_s21 }
  0x64   : > { %1943 = vmatmul.msk.f32.gmra.mxu0 %vm225_vm0, %v206_v15 }
  0x68   : > { %607 = vrot.lane.b32.xlu0 %v207_v16, %s2278_s22  ;;  %799 = vrot.lane.b32.xlu1 %v207_v16, %s2279_s23 }
  0x69   : > { %415 = vrot.lane.b32.xlu2 %v207_v16, %s2277_s21 }
  0x6b   : > { %v780_v17 = vpop.permute.xlu2 %779 }
  0x6c   : > { %1944 = vmatmul.msk.f32.gmra.mxu0 %vm225_vm0, %v207_v16 }
  0x70   : > { %609 = vrot.lane.b32.xlu0 %v208_v18, %s2278_s22  ;;  %801 = vrot.lane.b32.xlu1 %v208_v18, %s2279_s23 }
  0x71   : > { %417 = vrot.lane.b32.xlu2 %v208_v18, %s2277_s21 }
  0x73   : > { %v396_v19 = vpop.permute.xlu2 %395 }
  0x74   : > { %1945 = vmatmul.msk.f32.gmra.mxu0 %vm225_vm0, %v208_v18 }
  0x78   : > { %611 = vrot.lane.b32.xlu0 %v209_v20, %s2278_s22  ;;  %803 = vrot.lane.b32.xlu1 %v209_v20, %s2279_s23 }
  0x79   : > { %419 = vrot.lane.b32.xlu2 %v209_v20, %s2277_s21 }
  0x7b   : > { %v398_v21 = vpop.permute.xlu2 %397 }
  0x7c   : > { %1946 = vmatmul.msk.f32.gmra.mxu0 %vm225_vm0, %v209_v20  ;;  %v2057_v20 = vld [vmem:[%s3341_s2 + $0xe8] sm:$0xff] }
  0x7d   : > { %1163 = vmatpush.msrb.mxu3 %v2057_v20  ;;  %v2076_v20 = vld [vmem:[%s3341_s2 + $0x170] sm:$0xff] }
  0x7f   : > { %1164 = vmatpush.msrb.mxu3 %v2056_v50  ;;  %v2053_v50 = vld [vmem:[%s3341_s2 + $0xc8] sm:$0xff] }
  0x80   : > { %613 = vrot.lane.b32.xlu0 %v210_v22, %s2278_s22  ;;  %805 = vrot.lane.b32.xlu1 %v210_v22, %s2279_s23 }
  0x81   : > { %421 = vrot.lane.b32.xlu2 %v210_v22, %s2277_s21 }
  0x82   : > { %v394_v23 = vpop.permute.xlu1 %393  ;;  %v586_v24 = vpop.permute.xlu0 %585 }
  0x83   : > { %1958 = vmatmul.msk.f32.vlgmr.msrb.gmra.mxu1 %vm225_vm0, %v394_v23  ;;  %1983 = vmatmul.msk.f32.vlgmr.msra.gmra.mxu2 %vm225_vm0, %v586_v24  ;;  %v400_v25 = vpop.permute.xlu2 %399 }
  0x84   : > { %1947 = vmatmul.msk.f32.gmra.mxu0 %vm225_vm0, %v210_v22  ;;  %v2038_v22 = vld [vmem:[%s3341_s2 + $0x68] sm:$0xff] }
  0x85   : > { %1075 = vmatpush.msrb.mxu0 %v2038_v22 }
  0x88   : > { %615 = vrot.lane.b32.xlu0 %v211_v26, %s2278_s22  ;;  %807 = vrot.lane.b32.xlu1 %v211_v26, %s2279_s23 }
  0x89   : > { %423 = vrot.lane.b32.xlu2 %v211_v26, %s2277_s21 }
  0x8a   : > { %v588_v27 = vpop.permute.xlu1 %587  ;;  %v778_v28 = vpop.permute.xlu0 %777 }
  0x8b   : > { %1959 = vmatmul.msk.f32.gmra.mxu1 %vm225_vm0, %v396_v19  ;;  %1984 = vmatmul.msk.f32.gmra.mxu2 %vm225_vm0, %v588_v27  ;;  %v402_v29 = vpop.permute.xlu2 %401  ;;  %v2048_v19 = vld [vmem:[%s3341_s2 + $0xa8] sm:$0xff]  ;;  %v2037_v27 = vld [vmem:[%s3341_s2 + $0x60] sm:$0xff] }
  0x8c   : > { %2008 = vmatmul.msk.f32.vlgmr.msra.gmra.mxu3 %vm225_vm0, %v778_v28  ;;  %1948 = vmatmul.msk.f32.gmra.mxu0 %vm225_vm0, %v211_v26  ;;  %v1049_v26 = vld [vmem:[%s3341_s2 + $0x28] sm:$0xff]  ;;  %v2036_v28 = vld [vmem:[%s3341_s2 + $0x58] sm:$0xff] }
  0x8d   : > { %1130 = vmatpush.msrb.mxu2 %v2048_v19  ;;  %1098 = vmatpush.msra.mxu1 %v1049_v26  ;;  %v2045_v19 = vld [vmem:[%s3341_s2 + $0x90] sm:$0xff] }
  0x8e   : > { %1076 = vmatpush.msrb.mxu0 %v2037_v27 }
  0x90   : > { %617 = vrot.lane.b32.xlu0 %v2419_v30, %s2278_s22  ;;  %809 = vrot.lane.b32.xlu1 %v2419_v30, %s2279_s23 }
  0x91   : > { %425 = vrot.lane.b32.xlu2 %v2419_v30, %s2277_s21  ;;  %v2560_v12 = vpop.f32.mrf.mxu0  ;;  %1077 = vmatpush.msrb.mxu0 %v2036_v28  ;;  %v2055_v28 = vld [vmem:[%s3341_s2 + $0xd8] sm:$0xff] }
  0x92   : > { %v590_v31 = vpop.permute.xlu0 %589  ;;  %v782_v32 = vpop.permute.xlu1 %781  ;;  %1165 = vmatpush.msrb.mxu3 %v2055_v28 }
  0x93   : > { %1960 = vmatmul.msk.f32.gmra.mxu1 %vm225_vm0, %v398_v21  ;;  %1985 = vmatmul.msk.f32.gmra.mxu2 %vm225_vm0, %v590_v31  ;;  %v404_v33 = vpop.permute.xlu2 %403 }
  0x94   : > { %2009 = vmatmul.msk.f32.gmra.mxu3 %vm225_vm0, %v780_v17  ;;  %1949 = vmatmul.msk.f32.gmra.mxu0 %vm225_vm0, %v2419_v30  ;;  %v2035_v30 = vld [vmem:[%s3341_s2 + $0x50] sm:$0xff] }
  0x95   : > { %1078 = vmatpush.msrb.mxu0 %v2035_v30  ;;  %v2043_v30 = vld [vmem:[%s3341_s2 + $0x80] sm:$0xff] }
  0x98   : > { %619 = vrot.lane.b32.xlu0 %v2432_v34, %s2278_s22  ;;  %811 = vrot.lane.b32.xlu1 %v2432_v34, %s2279_s23 }
  0x99   : > { %427 = vrot.lane.b32.xlu2 %v2432_v34, %s2277_s21  ;;  %v2567_v16 = vpop.f32.mrf.mxu0 }
  0x9a   : > { %v592_v35 = vpop.permute.xlu0 %591  ;;  %v784_v36 = vpop.permute.xlu1 %783 }
  0x9b   : > { %1961 = vmatmul.msk.f32.gmra.mxu1 %vm225_vm0, %v400_v25  ;;  %1986 = vmatmul.msk.f32.gmra.mxu2 %vm225_vm0, %v592_v35  ;;  %v406_v37 = vpop.permute.xlu2 %405 }
  0x9c   : > { %2010 = vmatmul.msk.f32.gmra.mxu3 %vm225_vm0, %v782_v32  ;;  %1950 = vmatmul.msk.f32.gmra.mxu0 %vm225_vm0, %v2432_v34  ;;  %v2034_v32 = vld [vmem:[%s3341_s2 + $0x48] sm:$0xff] }
  0x9d   : > { %1079 = vmatpush.msrb.mxu0 %v2034_v32 }
  0xa0   : > { %621 = vrot.lane.b32.xlu0 %v2445_v38, %s2278_s22  ;;  %813 = vrot.lane.b32.xlu1 %v2445_v38, %s2279_s23 }
  0xa1   : > { %429 = vrot.lane.b32.xlu2 %v2445_v38, %s2277_s21  ;;  %v2582_v23 = vpop.f32.mrf.mxu0 }
  0xa2   : > { %v594_v39 = vpop.permute.xlu0 %593  ;;  %v786_v40 = vpop.permute.xlu1 %785 }
  0xa3   : > { %1962 = vmatmul.msk.f32.gmra.mxu1 %vm225_vm0, %v402_v29  ;;  %1987 = vmatmul.msk.f32.gmra.mxu2 %vm225_vm0, %v594_v39  ;;  %v408_v41 = vpop.permute.xlu2 %407  ;;  %v2598_v29 = vpop.f32.mrf.mxu1 }
  0xa4   : > { %2011 = vmatmul.msk.f32.gmra.mxu3 %vm225_vm0, %v784_v36  ;;  %1951 = vmatmul.msk.f32.gmra.mxu0 %vm225_vm0, %v2445_v38  ;;  %v2033_v36 = vld [vmem:[%s3341_s2 + $0x40] sm:$0xff] }
  0xa5   : > { %1080 = vmatpush.msrb.mxu0 %v2033_v36  ;;  %v2073_v36 = vld [vmem:[%s3341_s2 + $0x158] sm:$0xff] }
  0xa8   : > { %623 = vrot.lane.b32.xlu0 %v2458_v42, %s2278_s22  ;;  %815 = vrot.lane.b32.xlu1 %v2458_v42, %s2279_s23 }
  0xa9   : > { %431 = vrot.lane.b32.xlu2 %v2458_v42, %s2277_s21  ;;  %v2606_v35 = vpop.f32.mrf.mxu0 }
  0xaa   : > { %v596_v43 = vpop.permute.xlu0 %595  ;;  %v788_v44 = vpop.permute.xlu1 %787 }
  0xab   : > { %1963 = vmatmul.msk.f32.gmra.mxu1 %vm225_vm0, %v404_v33  ;;  %1988 = vmatmul.msk.f32.gmra.mxu2 %vm225_vm0, %v596_v43  ;;  %v410_v45 = vpop.permute.xlu2 %409 }
  0xac   : > { %2012 = vmatmul.msk.f32.gmra.mxu3 %vm225_vm0, %v786_v40  ;;  %1952 = vmatmul.msk.f32.gmra.mxu0 %vm225_vm0, %v2458_v42  ;;  %v2068_v42 = vld [vmem:[%s3341_s2 + $0x138] sm:$0xff] }
  0xad   : > { %1194 = vmatpush.msra.mxu0 %v2068_v42  ;;  %v2054_v42 = vld [vmem:[%s3341_s2 + $0xd0] sm:$0xff] }
  0xae   : > { %1166 = vmatpush.msrb.mxu3 %v2054_v42 }
  0xb0   : > { %625 = vrot.lane.b32.xlu0 %v2471_v46, %s2278_s22  ;;  %817 = vrot.lane.b32.xlu1 %v2471_v46, %s2279_s23 }
  0xb1   : > { %433 = vrot.lane.b32.xlu2 %v2471_v46, %s2277_s21  ;;  %v2625_v43 = vpop.f32.mrf.mxu0  ;;  %1167 = vmatpush.msrb.mxu3 %v2053_v50 }
  0xb2   : > { %v598_v47 = vpop.permute.xlu0 %597  ;;  %v790_v48 = vpop.permute.xlu1 %789 }
  0xb3   : > { %1964 = vmatmul.msk.f32.gmra.mxu1 %vm225_vm0, %v406_v37  ;;  %1989 = vmatmul.msk.f32.gmra.mxu2 %vm225_vm0, %v598_v47  ;;  %v412_v49 = vpop.permute.xlu2 %411  ;;  %v2066_v47 = vld [vmem:[%s3341_s2 + $0x128] sm:$0xff] }
  0xb4   : > { %2013 = vmatmul.msk.f32.gmra.mxu3 %vm225_vm0, %v788_v44  ;;  %1953 = vmatmul.msk.f32.gmra.mxu0 %vm225_vm0, %v2471_v46 }
  0xb8   : > { %627 = vrot.lane.b32.xlu0 %v2487_v51, %s2278_s22  ;;  %819 = vrot.lane.b32.xlu1 %v2487_v51, %s2279_s23 }
  0xb9   : > { %435 = vrot.lane.b32.xlu2 %v2487_v51, %s2277_s21 }
  0xba   : > { %v600_v52 = vpop.permute.xlu0 %599  ;;  %v792_v53 = vpop.permute.xlu1 %791 }
  0xbb   : > { %1965 = vmatmul.msk.f32.gmra.mxu1 %vm225_vm0, %v408_v41  ;;  %1990 = vmatmul.msk.f32.gmra.mxu2 %vm225_vm0, %v600_v52  ;;  %v414_v54 = vpop.permute.xlu2 %413  ;;  %v2047_v41 = vld [vmem:[%s3341_s2 + $0xa0] sm:$0xff] }
  0xbc   : > { %2014 = vmatmul.msk.f32.gmra.mxu3 %vm225_vm0, %v790_v48  ;;  %1954 = vmatmul.msk.f32.gmra.mxu0 %vm225_vm0, %v2487_v51  ;;  %v1048_v51 = vld [vmem:[%s3341_s2 + $0x20] sm:$0xff] }
  0xbd   : > { %1131 = vmatpush.msrb.mxu2 %v2047_v41  ;;  %v2065_v52 = vld [vmem:[%s3341_s2 + $0x120] sm:$0xff]  ;;  %1099 = vmatpush.msra.mxu1 %v1048_v51  ;;  %v2071_v51 = vld [vmem:[%s3341_s2 + $0x148] sm:$0xff] }
  0xbf   : > { %1100 = vmatpush.msra.mxu1 %v1047_v2 }
  0xc0   : > { %629 = vrot.lane.b32.xlu0 %v218_v57, %s2278_s22  ;;  %821 = vrot.lane.b32.xlu1 %v218_v57, %s2279_s23 }
  0xc1   : > { %437 = vrot.lane.b32.xlu2 %v218_v57, %s2277_s21  ;;  %1101 = vmatpush.msra.mxu1 %v1046_v7  ;;  %v2094_v7 = vld [vmem:[%s3341_s2 + $0x1f0] sm:$0xff] }
  0xc2   : > { %v602_v58 = vpop.permute.xlu0 %601  ;;  %v794_v59 = vpop.permute.xlu1 %793 }
  0xc3   : > { %1966 = vmatmul.msk.f32.gmra.mxu1 %vm225_vm0, %v410_v45  ;;  %1991 = vmatmul.msk.f32.gmra.mxu2 %vm225_vm0, %v602_v58  ;;  %v416_v60 = vpop.permute.xlu2 %415  ;;  %v2067_v45 = vld [vmem:[%s3341_s2 + $0x130] sm:$0xff] }
  0xc4   : > { %2015 = vmatmul.msk.f32.gmra.mxu3 %vm225_vm0, %v792_v53  ;;  %1955 = vmatmul.msk.f32.gmra.mxu0 %vm225_vm0, %v218_v57  ;;  %v2064_v53 = vld [vmem:[%s3341_s2 + $0x118] sm:$0xff]  ;;  %v2653_v57 = vpop.f32.mrf.mxu0 }
  0xc5   : > { %1195 = vmatpush.msra.mxu0 %v2067_v45  ;;  %v2072_v45 = vld [vmem:[%s3341_s2 + $0x150] sm:$0xff] }
  0xc7   : > { %1196 = vmatpush.msra.mxu0 %v2066_v47  ;;  %v2084_v47 = vld [vmem:[%s3341_s2 + $0x1a8] sm:$0xff] }
  0xc8   : > { %631 = vrot.lane.b32.xlu0 %v2519_v62, %s2278_s22  ;;  %823 = vrot.lane.b32.xlu1 %v2519_v62, %s2279_s23 }
  0xc9   : > { %439 = vrot.lane.b32.xlu2 %v2519_v62, %s2277_s21  ;;  %1197 = vmatpush.msra.mxu0 %v2065_v52 }
  0xca   : > { %v604_v63 = vpop.permute.xlu0 %603  ;;  %v796_v0 = vpop.permute.xlu1 %795 }
  0xcb   : > { %1967 = vmatmul.msk.f32.gmra.mxu1 %vm225_vm0, %v412_v49  ;;  %1992 = vmatmul.msk.f32.gmra.mxu2 %vm225_vm0, %v604_v63  ;;  %v418_v1 = vpop.permute.xlu2 %417  ;;  %v2061_v63 = vld [vmem:[%s3341_s2 + $0x100] sm:$0xff] }
  0xcc   : > { %2016 = vmatmul.msk.f32.gmra.mxu3 %vm225_vm0, %v794_v59  ;;  %1956 = vmatmul.msk.f32.gmra.mxu0 %vm225_vm0, %v2519_v62 }
  0xcd   : > { %1198 = vmatpush.msra.mxu0 %v2064_v53  ;;  %v2083_v53 = vld [vmem:[%s3341_s2 + $0x1a0] sm:$0xff] }
  0xcf   : > { %1199 = vmatpush.msra.mxu0 %v2063_v56  ;;  %v2052_v56 = vld [vmem:[%s3341_s2 + $0xc0] sm:$0xff] }
  0xd0   : > { %633 = vrot.lane.b32.xlu0 %v2377_v14, %s2278_s22  ;;  %825 = vrot.lane.b32.xlu1 %v2377_v14, %s2279_s23 }
  0xd1   : > { %441 = vrot.lane.b32.xlu2 %v2377_v14, %s2277_s21  ;;  %1168 = vmatpush.msrb.mxu3 %v2052_v56 }
  0xd2   : > { %v606_v3 = vpop.permute.xlu0 %605  ;;  %v798_v4 = vpop.permute.xlu1 %797 }
  0xd3   : > { %1968 = vmatmul.msk.f32.gmra.mxu1 %vm225_vm0, %v414_v54  ;;  %1993 = vmatmul.msk.f32.gmra.mxu2 %vm225_vm0, %v606_v3  ;;  %v420_v5 = vpop.permute.xlu2 %419 }
  0xd4   : > { %2017 = vmatmul.msk.f32.gmra.mxu3 %vm225_vm0, %v796_v0 }
  0xda   : > { %v608_v8 = vpop.permute.xlu0 %607  ;;  %v800_v9 = vpop.permute.xlu1 %799 }
  0xdb   : > { %1969 = vmatmul.msk.f32.gmra.mxu1 %vm225_vm0, %v416_v60  ;;  %1994 = vmatmul.msk.f32.gmra.mxu2 %vm225_vm0, %v608_v8  ;;  %v422_v10 = vpop.permute.xlu2 %421  ;;  %v2062_v60 = vld [vmem:[%s3341_s2 + $0x108] sm:$0xff]  ;;  %v2679_v8 = vpop.f32.mrf.mxu0 }
  0xdc   : > { %2018 = vmatmul.msk.f32.gmra.mxu3 %vm225_vm0, %v798_v4  ;;  %1200 = vmatpush.msra.mxu0 %v2062_v60  ;;  %v2070_v60 = vld [vmem:[%s3341_s2 + $0x140] sm:$0xff] }
  0xde   : > { %1201 = vmatpush.msra.mxu0 %v2061_v63 }
  0xe2   : > { %v610_v13 = vpop.permute.xlu0 %609  ;;  %v802_v14 = vpop.permute.xlu1 %801 }
  0xe3   : > { %1970 = vmatmul.msk.f32.gmra.mxu1 %vm225_vm0, %v418_v1  ;;  %1995 = vmatmul.msk.f32.gmra.mxu2 %vm225_vm0, %v610_v13  ;;  %v424_v15 = vpop.permute.xlu2 %423  ;;  %v1045_v13 = vld [vmem:[%s3341_s2 + $0x8] sm:$0xff]  ;;  %v2726_v32 = vpop.f32.mrf.mxu0 }
  0xe4   : > { %2019 = vmatmul.msk.f32.gmra.mxu3 %vm225_vm0, %v800_v9  ;;  %1102 = vmatpush.msra.mxu1 %v1045_v13  ;;  %v2099_v13 = vld [vmem:[%s3341_s2 + $0x210] sm:$0xff] }
  0xea   : > { %v612_v17 = vpop.permute.xlu0 %611  ;;  %v804_v18 = vpop.permute.xlu1 %803 }
  0xeb   : > { %1971 = vmatmul.msk.f32.gmra.mxu1 %vm225_vm0, %v420_v5  ;;  %1996 = vmatmul.msk.f32.gmra.mxu2 %vm225_vm0, %v612_v17  ;;  %v426_v21 = vpop.permute.xlu2 %425  ;;  %v2787_v63 = vpop.f32.mrf.mxu0 }
  0xec   : > { %2020 = vmatmul.msk.f32.gmra.mxu3 %vm225_vm0, %v802_v14  ;;  %v1044_v14 = vld [vmem:[%s3341_s2] sm:$0xff] }
  0xed   : > { %1103 = vmatpush.msra.mxu1 %v1044_v14  ;;  %v2080_v14 = vld [vmem:[%s3341_s2 + $0x188] sm:$0xff] }
  0xf2   : > { %v614_v24 = vpop.permute.xlu0 %613  ;;  %v806_v25 = vpop.permute.xlu1 %805 }
  0xf3   : > { %1972 = vmatmul.msk.f32.gmra.mxu1 %vm225_vm0, %v422_v10  ;;  %1997 = vmatmul.msk.f32.gmra.mxu2 %vm225_vm0, %v614_v24  ;;  %v428_v31 = vpop.permute.xlu2 %427  ;;  %v2044_v24 = vld [vmem:[%s3341_s2 + $0x88] sm:$0xff]  ;;  %v2836_v28 = vpop.f32.mrf.mxu0 }
  0xf4   : > { %2021 = vmatmul.msk.f32.gmra.mxu3 %vm225_vm0, %v804_v18 }
  0xfa   : > { %v616_v33 = vpop.permute.xlu0 %615  ;;  %v808_v34 = vpop.permute.xlu1 %807 }
  0xfb   : > { %1973 = vmatmul.msk.f32.gmra.mxu1 %vm225_vm0, %v424_v15  ;;  %1998 = vmatmul.msk.f32.gmra.mxu2 %vm225_vm0, %v616_v33  ;;  %v430_v40 = vpop.permute.xlu2 %429  ;;  %v2046_v15 = vld [vmem:[%s3341_s2 + $0x98] sm:$0xff] }
  0xfc   : > { %2022 = vmatmul.msk.f32.gmra.mxu3 %vm225_vm0, %v806_v25  ;;  %1132 = vmatpush.msrb.mxu2 %v2046_v15  ;;  %v2075_v25 = vld [vmem:[%s3341_s2 + $0x168] sm:$0xff]  ;;  %v2086_v33 = vld [vmem:[%s3341_s2 + $0x1b8] sm:$0xff] }
  0xfd   : > { %v2093_v15 = vld [vmem:[%s3341_s2 + $0x1e8] sm:$0xff] }
  0xfe   : > { %1133 = vmatpush.msrb.mxu2 %v2045_v19  ;;  %v2079_v19 = vld [vmem:[%s3341_s2 + $0x180] sm:$0xff] }
 0x100   : > { %v2614_v37 = vpop.f32.mrf.mxu1  ;;  %1134 = vmatpush.msrb.mxu2 %v2044_v24 }
 0x102   : > { %v618_v38 = vpop.permute.xlu0 %617  ;;  %v810_v39 = vpop.permute.xlu1 %809  ;;  %1135 = vmatpush.msrb.mxu2 %v2043_v30 }
 0x103   : > { %1974 = vmatmul.msk.f32.gmra.mxu1 %vm225_vm0, %v426_v21  ;;  %1999 = vmatmul.msk.f32.gmra.mxu2 %vm225_vm0, %v618_v38  ;;  %v432_v54 = vpop.permute.xlu2 %431 }
 0x104   : > { %2023 = vmatmul.msk.f32.gmra.mxu3 %vm225_vm0, %v808_v34  ;;  %v2104_v34 = vld [vmem:[%s3341_s2 + $0x238] sm:$0xff]  ;;  %1260 = vmatpush.msra.mxu2 %v2086_v33  ;;  %v2090_v33 = vld [vmem:[%s3341_s2 + $0x1d0] sm:$0xff] }
 0x106   : > { %v2627_v44 = vpop.f32.mrf.mxu2 }
 0x108   : > { %v513_v46 = vpop.f32.mrf.mxu1 }
 0x109   : > { %v970_v0 = vmax.f32 %v2567_v16, %v513_v46  ;;  %v2077_v16 = vld [vmem:[%s3341_s2 + $0x178] sm:$0xff] }
 0x10a   : > { %v620_v48 = vpop.permute.xlu0 %619  ;;  %v812_v49 = vpop.permute.xlu1 %811  ;;  %1227 = vmatpush.msrb.mxu1 %v2077_v16  ;;  %v2098_v16 = vld [vmem:[%s3341_s2 + $0x208] sm:$0xff] }
 0x10b   : > { %1975 = vmatmul.msk.f32.gmra.mxu1 %vm225_vm0, %v428_v31  ;;  %2000 = vmatmul.msk.f32.gmra.mxu2 %vm225_vm0, %v620_v48  ;;  %v434_v4 = vpop.permute.xlu2 %433  ;;  %v2074_v31 = vld [vmem:[%s3341_s2 + $0x160] sm:$0xff]  ;;  %v2102_v48 = vld [vmem:[%s3341_s2 + $0x228] sm:$0xff] }
 0x10c   : > { %2024 = vmatmul.msk.f32.gmra.mxu3 %vm225_vm0, %v810_v39  ;;  %1228 = vmatpush.msrb.mxu1 %v2076_v20  ;;  %v2085_v39 = vld [vmem:[%s3341_s2 + $0x1b0] sm:$0xff] }
 0x10d   : > { %1261 = vmatpush.msra.mxu2 %v2085_v39 }
 0x10e   : > { %v705_v55 = vpop.f32.mrf.mxu2  ;;  %1229 = vmatpush.msrb.mxu1 %v2075_v25  ;;  %v2097_v25 = vld [vmem:[%s3341_s2 + $0x200] sm:$0xff] }
 0x10f   : > { %v2655_v58 = vpop.f32.mrf.mxu3  ;;  %1262 = vmatpush.msra.mxu2 %v2084_v47  ;;  %v2854_v47 = vpop.f32.mrf.mxu0 }
 0x110   : > { %v2657_v59 = vpop.f32.mrf.mxu1  ;;  %1230 = vmatpush.msrb.mxu1 %v2074_v31  ;;  %v994_v50 = vmax.f32 %v2627_v44, %v2655_v58 }
 0x111   : > { %1263 = vmatpush.msra.mxu2 %v2083_v53 }
 0x112   : > { %v622_v61 = vpop.permute.xlu0 %621  ;;  %v814_v62 = vpop.permute.xlu1 %813  ;;  %1231 = vmatpush.msrb.mxu1 %v2073_v36 }
 0x113   : > { %1976 = vmatmul.msk.f32.gmra.mxu1 %vm225_vm0, %v430_v40  ;;  %2001 = vmatmul.msk.f32.gmra.mxu2 %vm225_vm0, %v622_v61  ;;  %v436_v22 = vpop.permute.xlu2 %435  ;;  %v2103_v40 = vld [vmem:[%s3341_s2 + $0x230] sm:$0xff]  ;;  %v2082_v61 = vld [vmem:[%s3341_s2 + $0x198] sm:$0xff] }
 0x114   : > { %2025 = vmatmul.msk.f32.gmra.mxu3 %vm225_vm0, %v812_v49  ;;  %1232 = vmatpush.msrb.mxu1 %v2072_v45 }
 0x115   : > { %1264 = vmatpush.msra.mxu2 %v2082_v61 }
 0x116   : > { %v2669_v1 = vpop.f32.mrf.mxu2  ;;  %1233 = vmatpush.msrb.mxu1 %v2071_v51  ;;  %v971_v51 = vmax.f32 %v2582_v23, %v2657_v59  ;;  %v2138_v23 = vld [vmem:[%s3341_s2 + $0x328] sm:$0xff] }
 0x117   : > { %v897_v3 = vpop.f32.mrf.mxu3 }
 0x118   : > { %v995_v5 = vmax.f32 %v705_v55, %v897_v3  ;;  %v2674_v6 = vpop.f32.mrf.mxu1  ;;  %v2100_v3 = vld [vmem:[%s3341_s2 + $0x218] sm:$0xff]  ;;  %1234 = vmatpush.msrb.mxu1 %v2070_v60 }
 0x11a   : > { %v1020_v9 = vmax.f32 %v970_v0, %v995_v5  ;;  %v624_v10 = vpop.permute.xlu0 %623  ;;  %v816_v11 = vpop.permute.xlu1 %815  ;;  %v2081_v5 = vld [vmem:[%s3341_s2 + $0x190] sm:$0xff] }
 0x11b   : > { %1977 = vmatmul.msk.f32.gmra.mxu1 %vm225_vm0, %v432_v54  ;;  %2002 = vmatmul.msk.f32.gmra.mxu2 %vm225_vm0, %v624_v10  ;;  %v2101_v54 = vld [vmem:[%s3341_s2 + $0x220] sm:$0xff]  ;;  %v438_v55 = vpop.permute.xlu2 %437 }
 0x11c   : > { %2026 = vmatmul.msk.f32.gmra.mxu3 %vm225_vm0, %v814_v62  ;;  %2041 = vmatmul.msk.f32.vlgmr.msrb.gmra.mxu0 %vm1061_vm1, %v1020_v9  ;;  %v2095_v62 = vld [vmem:[%s3341_s2 + $0x1f8] sm:$0xff] }
 0x11d   : > { %1326 = vmatpush.msrb.mxu0 %v2104_v34  ;;  %1293 = vmatpush.msra.mxu3 %v2095_v62  ;;  %v2089_v34 = vld [vmem:[%s3341_s2 + $0x1c8] sm:$0xff]  ;;  %v2896_v62 = vpop.f32.mrf.mxu0 }
 0x11e   : > { %v2697_v17 = vpop.f32.mrf.mxu2  ;;  %1265 = vmatpush.msra.mxu2 %v2081_v5 }
 0x11f   : > { %v2699_v18 = vpop.f32.mrf.mxu3  ;;  %1327 = vmatpush.msrb.mxu0 %v2103_v40  ;;  %1294 = vmatpush.msra.mxu3 %v2094_v7  ;;  %v972_v7 = vmax.f32 %v2606_v35, %v2674_v6  ;;  %v2110_v35 = vld [vmem:[%s3341_s2 + $0x260] sm:$0xff] }
 0x120   : > { %v2707_v21 = vpop.f32.mrf.mxu1  ;;  %1266 = vmatpush.msra.mxu2 %v2080_v14 }
 0x121   : > { %1328 = vmatpush.msrb.mxu0 %v2102_v48  ;;  %v973_v0 = vmax.f32 %v2625_v43, %v2707_v21  ;;  %v2092_v21 = vld [vmem:[%s3341_s2 + $0x1e0] sm:$0xff]  ;;  %1295 = vmatpush.msra.mxu3 %v2093_v15  ;;  %v2109_v15 = vld [vmem:[%s3341_s2 + $0x258] sm:$0xff] }
 0x122   : > { %v626_v26 = vpop.permute.xlu0 %625  ;;  %v818_v27 = vpop.permute.xlu1 %817  ;;  %1267 = vmatpush.msra.mxu2 %v2079_v19  ;;  %v2131_v19 = vld [vmem:[%s3341_s2 + $0x2f8] sm:$0xff] }
 0x123   : > { %1978 = vmatmul.msk.f32.gmra.mxu1 %vm225_vm0, %v434_v4  ;;  %2003 = vmatmul.msk.f32.gmra.mxu2 %vm225_vm0, %v626_v26  ;;  %v440_v24 = vpop.permute.xlu2 %439 }
 0x124   : > { %2027 = vmatmul.msk.f32.gmra.mxu3 %vm225_vm0, %v816_v11  ;;  %1329 = vmatpush.msrb.mxu0 %v2101_v54  ;;  %v2139_v54 = vld [vmem:[%s3341_s2 + $0x330] sm:$0xff] }
 0x125   : > { %1296 = vmatpush.msra.mxu3 %v2092_v21  ;;  %v2108_v21 = vld [vmem:[%s3341_s2 + $0x250] sm:$0xff] }
 0x126   : > { %v714_v38 = vpop.f32.mrf.mxu2  ;;  %1330 = vmatpush.msrb.mxu0 %v2100_v3  ;;  %v2136_v3 = vld [vmem:[%s3341_s2 + $0x318] sm:$0xff] }
 0x127   : > { %v2744_v41 = vpop.f32.mrf.mxu3 }
 0x128   : > { %v2752_v46 = vpop.f32.mrf.mxu1  ;;  %1331 = vmatpush.msrb.mxu0 %v2099_v13 }
 0x129   : > { %v974_v61 = vmax.f32 %v2653_v57, %v2752_v46  ;;  %v2111_v46 = vld [vmem:[%s3341_s2 + $0x268] sm:$0xff] }
 0x12a   : > { %v628_v49 = vpop.permute.xlu0 %627  ;;  %v820_v52 = vpop.permute.xlu1 %819  ;;  %1332 = vmatpush.msrb.mxu0 %v2098_v16  ;;  %v2119_v16 = vld [vmem:[%s3341_s2 + $0x2a0] sm:$0xff] }
 0x12b   : > { %1979 = vmatmul.msk.f32.gmra.mxu1 %vm225_vm0, %v436_v22  ;;  %2004 = vmatmul.msk.f32.gmra.mxu2 %vm225_vm0, %v628_v49  ;;  %v442_v45 = vpop.permute.xlu2 %441  ;;  %v2140_v49 = vld [vmem:[%s3341_s2 + $0x338] sm:$0xff] }
 0x12c   : > { %2028 = vmatmul.msk.f32.gmra.mxu3 %vm225_vm0, %v818_v27  ;;  %v2091_v27 = vld [vmem:[%s3341_s2 + $0x1d8] sm:$0xff]  ;;  %1333 = vmatpush.msrb.mxu0 %v2097_v25  ;;  %v2133_v25 = vld [vmem:[%s3341_s2 + $0x300] sm:$0xff] }
 0x12d   : > { %1297 = vmatpush.msra.mxu3 %v2091_v27 }
 0x12e   : > { %v2791_v2 = vpop.f32.mrf.mxu2 }
 0x12f   : > { %v906_v4 = vpop.f32.mrf.mxu3  ;;  %1298 = vmatpush.msra.mxu3 %v2090_v33 }
 0x130   : > { %v998_v43 = vmax.f32 %v714_v38, %v906_v4  ;;  %v2802_v9 = vpop.f32.mrf.mxu1  ;;  %v2088_v38 = vld [vmem:[%s3341_s2 + $0x1c0] sm:$0xff] }
 0x131   : > { %1299 = vmatpush.msra.mxu3 %v2089_v34  ;;  %v975_v4 = vmax.f32 %v2679_v8, %v2802_v9  ;;  %v2135_v9 = vld [vmem:[%s3341_s2 + $0x310] sm:$0xff] }
 0x132   : > { %v1023_v10 = vmax.f32 %v973_v0, %v998_v43  ;;  %v630_v11 = vpop.permute.xlu0 %629  ;;  %v822_v20 = vpop.permute.xlu1 %821  ;;  %v2121_v0 = vld [vmem:[%s3341_s2 + $0x2b0] sm:$0xff]  ;;  %v997_v43 = vmax.f32 %v2697_v17, %v2744_v41 }
 0x133   : > { %1980 = vmatmul.msk.f32.gmra.mxu1 %vm225_vm0, %v438_v55  ;;  %2005 = vmatmul.msk.f32.gmra.mxu2 %vm225_vm0, %v630_v11  ;;  %v969_v55 = vmax.f32 %v2560_v12, %v2614_v37  ;;  %v2122_v12 = vld [vmem:[%s3341_s2 + $0x2b8] sm:$0xff]  ;;  %v2137_v37 = vld [vmem:[%s3341_s2 + $0x320] sm:$0xff] }
 0x134   : > { %2029 = vmatmul.msk.f32.gmra.mxu3 %vm225_vm0, %v820_v52  ;;  %2069 = vmatmul.msk.f32.vlgmr.msra.gmra.mxu0 %vm1061_vm1, %v1023_v10  ;;  %v996_v52 = vmax.f32 %v2669_v1, %v2699_v18  ;;  %v2113_v1 = vld [vmem:[%s3341_s2 + $0x278] sm:$0xff]  ;;  %v2112_v18 = vld [vmem:[%s3341_s2 + $0x270] sm:$0xff]  ;;  %v1022_v13 = vmax.f32 %v972_v7, %v997_v43 }
 0x135   : > { %1300 = vmatpush.msra.mxu3 %v2088_v38  ;;  %1458 = vmatpush.msra.mxu0 %v2140_v49  ;;  %v1019_v44 = vmax.f32 %v969_v55, %v994_v50  ;;  %v2107_v38 = vld [vmem:[%s3341_s2 + $0x248] sm:$0xff]  ;;  %v2115_v49 = vld [vmem:[%s3341_s2 + $0x280] sm:$0xff]  ;;  %v2157_v55 = vld [vmem:[%s3341_s2 + $0x3b0] sm:$0xff] }
 0x136   : > { %v2826_v22 = vpop.f32.mrf.mxu2  ;;  %v1021_v58 = vmax.f32 %v971_v51, %v996_v52  ;;  %v2128_v50 = vld [vmem:[%s3341_s2 + $0x2e0] sm:$0xff]  ;;  %v2149_v51 = vld [vmem:[%s3341_s2 + $0x378] sm:$0xff]  ;;  %v2144_v7 = vld [vmem:[%s3341_s2 + $0x350] sm:$0xff] }
 0x137   : > { %v2831_v26 = vpop.f32.mrf.mxu3  ;;  %1459 = vmatpush.msra.mxu0 %v2139_v54  ;;  %v2158_v52 = vld [vmem:[%s3341_s2 + $0x3b8] sm:$0xff]  ;;  %v2148_v54 = vld [vmem:[%s3341_s2 + $0x370] sm:$0xff] }
 0x138   : > { %v2838_v30 = vpop.f32.mrf.mxu1  ;;  %v999_v5 = vmax.f32 %v2791_v2, %v2831_v26  ;;  %v2120_v2 = vld [vmem:[%s3341_s2 + $0x2a8] sm:$0xff]  ;;  %v2957_v26 = vpop.f32.mrf.mxu0  ;;  %v2166_v43 = vld [vmem:[%s3341_s2 + $0x3f0] sm:$0xff] }
 0x139   : > { %1460 = vmatpush.msra.mxu0 %v2138_v23  ;;  %v976_v27 = vmax.f32 %v2726_v32, %v2838_v30  ;;  %v2129_v32 = vld [vmem:[%s3341_s2 + $0x2e8] sm:$0xff]  ;;  %v2126_v23 = vld [vmem:[%s3341_s2 + $0x2d0] sm:$0xff] }
 0x13a   : > { %v632_v31 = vpop.permute.xlu0 %631  ;;  %v824_v40 = vpop.permute.xlu1 %823  ;;  %v1024_v41 = vmax.f32 %v974_v61, %v999_v5  ;;  %v2167_v5 = vld [vmem:[%s3341_s2 + $0x3f8] sm:$0xff] }
 0x13b   : > { %1981 = vmatmul.msk.f32.gmra.mxu1 %vm225_vm0, %v440_v24  ;;  %2006 = vmatmul.msk.f32.gmra.mxu2 %vm225_vm0, %v632_v31  ;;  %v2130_v24 = vld [vmem:[%s3341_s2 + $0x2f0] sm:$0xff] }
 0x13c   : > { %2030 = vmatmul.msk.f32.gmra.mxu3 %vm225_vm0, %v822_v20  ;;  %1461 = vmatpush.msra.mxu0 %v2137_v37  ;;  %v2134_v20 = vld [vmem:[%s3341_s2 + $0x308] sm:$0xff] }
 0x13d   : > { %v2125_v37 = vld [vmem:[%s3341_s2 + $0x2c8] sm:$0xff] }
 0x13e   : > { %v2849_v36 = vpop.f32.mrf.mxu2  ;;  %1462 = vmatpush.msra.mxu0 %v2136_v3  ;;  %v2155_v3 = vld [vmem:[%s3341_s2 + $0x3a0] sm:$0xff] }
 0x13f   : > { %v912_v39 = vpop.f32.mrf.mxu3 }
 0x140   : > { %v534_v42 = vpop.f32.mrf.mxu1  ;;  %v1000_v57 = vmax.f32 %v2826_v22, %v912_v39  ;;  %1463 = vmatpush.msra.mxu0 %v2135_v9  ;;  %v2118_v22 = vld [vmem:[%s3341_s2 + $0x298] sm:$0xff]  ;;  %v2117_v39 = vld [vmem:[%s3341_s2 + $0x290] sm:$0xff] }
 0x141   : > { %v977_v10 = vmax.f32 %v2787_v63, %v534_v42  ;;  %v2116_v42 = vld [vmem:[%s3341_s2 + $0x288] sm:$0xff]  ;;  %v2175_v9 = vld [vmem:[%s3341_s2 + $0x430] sm:$0xff] }
 0x142   : > { %v634_v48 = vpop.permute.xlu0 %633  ;;  %v826_v59 = vpop.permute.xlu1 %825  ;;  %v1025_v63 = vmax.f32 %v975_v4, %v1000_v57  ;;  %1464 = vmatpush.msra.mxu0 %v2134_v20  ;;  %v2145_v4 = vld [vmem:[%s3341_s2 + $0x358] sm:$0xff]  ;;  %v2173_v20 = vld [vmem:[%s3341_s2 + $0x420] sm:$0xff] }
 0x143   : > { %1982 = vmatmul.msk.f32.gmra.mxu1 %vm225_vm0, %v442_v45  ;;  %2007 = vmatmul.msk.f32.gmra.mxu2 %vm225_vm0, %v634_v48  ;;  %v2154_v57 = vld [vmem:[%s3341_s2 + $0x398] sm:$0xff] }
 0x144   : > { %2031 = vmatmul.msk.f32.gmra.mxu3 %vm225_vm0, %v824_v40  ;;  %1465 = vmatpush.msra.mxu0 %v2133_v25 }
 0x146   : > { %v726_v53 = vpop.f32.mrf.mxu2 }
 0x147   : > { %v2873_v56 = vpop.f32.mrf.mxu3 }
 0x148   : > { %v2875_v60 = vpop.f32.mrf.mxu1  ;;  %v1001_v31 = vmax.f32 %v2849_v36, %v2873_v56  ;;  %v2106_v36 = vld [vmem:[%s3341_s2 + $0x240] sm:$0xff] }
 0x149   : > { %v978_v33 = vmax.f32 %v2836_v28, %v2875_v60 }
 0x14a   : > { %v1026_v45 = vmax.f32 %v976_v27, %v1001_v31  ;;  %v2162_v31 = vld [vmem:[%s3341_s2 + $0x3d0] sm:$0xff] }
 0x14b   : > { %2042 = vmatmul.msk.f32.vlgmr.msra.gmra.mxu1 %vm1061_vm1, %v1019_v44  ;;  %2051 = vmatmul.msk.f32.vlgmr.msrb.gmra.mxu2 %vm1061_vm1, %v1021_v58  ;;  %v2147_v58 = vld [vmem:[%s3341_s2 + $0x368] sm:$0xff] }
 0x14c   : > { %2032 = vmatmul.msk.f32.gmra.mxu3 %vm225_vm0, %v826_v59  ;;  %1359 = vmatpush.msra.mxu1 %v2113_v1  ;;  %v2156_v59 = vld [vmem:[%s3341_s2 + $0x3a8] sm:$0xff]  ;;  %v3016_v1 = vpop.f32.mrf.mxu0 }
 0x14d   : > { %1392 = vmatpush.msrb.mxu2 %v2122_v12 }
 0x14e   : > { %v729_v8 = vpop.f32.mrf.mxu2  ;;  %1360 = vmatpush.msra.mxu1 %v2112_v18  ;;  %v2146_v18 = vld [vmem:[%s3341_s2 + $0x360] sm:$0xff] }
 0x14f   : > { %v918_v11 = vpop.f32.mrf.mxu3  ;;  %1393 = vmatpush.msrb.mxu2 %v2121_v0  ;;  %v2124_v0 = vld [vmem:[%s3341_s2 + $0x2c0] sm:$0xff] }
 0x150   : > { %v1002_v6 = vmax.f32 %v726_v53, %v918_v11  ;;  %v2927_v17 = vpop.f32.mrf.mxu1  ;;  %1361 = vmatpush.msra.mxu1 %v2111_v46  ;;  %v2127_v53 = vld [vmem:[%s3341_s2 + $0x2d8] sm:$0xff] }
 0x151   : > { %1394 = vmatpush.msrb.mxu2 %v2120_v2  ;;  %v979_v56 = vmax.f32 %v2854_v47, %v2927_v17  ;;  %v2176_v46 = vld [vmem:[%s3341_s2 + $0x438] sm:$0xff]  ;;  %v2153_v2 = vld [vmem:[%s3341_s2 + $0x390] sm:$0xff] }
 0x152   : > { %v1027_v14 = vmax.f32 %v977_v10, %v1002_v6  ;;  %1362 = vmatpush.msra.mxu1 %v2110_v35  ;;  %v2143_v35 = vld [vmem:[%s3341_s2 + $0x348] sm:$0xff] }
 0x153   : > { %2078 = vmatmul.msk.f32.vlgmr.msrb.gmra.mxu1 %vm1061_vm1, %v1024_v41  ;;  %2087 = vmatmul.msk.f32.vlgmr.msra.gmra.mxu2 %vm1061_vm1, %v1025_v63  ;;  %v2152_v41 = vld [vmem:[%s3341_s2 + $0x388] sm:$0xff] }
 0x154   : > { %2060 = vmatmul.msk.f32.vlgmr.msrb.gmra.mxu3 %vm1061_vm1, %v1022_v13  ;;  %2105 = vmatmul.msk.f32.vlgmr.msrb.gmra.mxu0 %vm1061_vm1, %v1027_v14  ;;  %v2174_v63 = vld [vmem:[%s3341_s2 + $0x428] sm:$0xff]  ;;  %v2142_v13 = vld [vmem:[%s3341_s2 + $0x340] sm:$0xff]  ;;  %v3076_v14 = vpop.f32.mrf.mxu0 }
 0x155   : > { %1363 = vmatpush.msra.mxu1 %v2109_v15  ;;  %1395 = vmatpush.msrb.mxu2 %v2119_v16  ;;  %v2151_v16 = vld [vmem:[%s3341_s2 + $0x380] sm:$0xff] }
 0x156   : > { %v732_v34 = vpop.f32.mrf.mxu2  ;;  %1425 = vmatpush.msrb.mxu3 %v2131_v19  ;;  %1590 = vmatpush.msrb.mxu0 %v2176_v46  ;;  %v2164_v19 = vld [vmem:[%s3341_s2 + $0x3e0] sm:$0xff]  ;;  %v2188_v46 = vld [vmem:[%s3341_s2 + $0x488] sm:$0xff] }
 0x157   : > { %v921_v40 = vpop.f32.mrf.mxu3  ;;  %1364 = vmatpush.msra.mxu1 %v2108_v21  ;;  %1396 = vmatpush.msrb.mxu2 %v2118_v22  ;;  %v2163_v21 = vld [vmem:[%s3341_s2 + $0x3d8] sm:$0xff] }
 0x158   : > { %v1003_v30 = vmax.f32 %v729_v8, %v921_v40  ;;  %v2974_v28 = vpop.f32.mrf.mxu1  ;;  %1426 = vmatpush.msrb.mxu3 %v2130_v24  ;;  %1591 = vmatpush.msrb.mxu0 %v2175_v9  ;;  %v2185_v22 = vld [vmem:[%s3341_s2 + $0x478] sm:$0xff] }
 0x159   : > { %1365 = vmatpush.msra.mxu1 %v2107_v38  ;;  %1397 = vmatpush.msrb.mxu2 %v2117_v39  ;;  %v980_v10 = vmax.f32 %v2896_v62, %v2974_v28  ;;  %v2165_v62 = vld [vmem:[%s3341_s2 + $0x3e8] sm:$0xff]  ;;  %v2172_v24 = vld [vmem:[%s3341_s2 + $0x418] sm:$0xff]  ;;  %v2171_v38 = vld [vmem:[%s3341_s2 + $0x410] sm:$0xff] }
 0x15a   : > { %v1028_v48 = vmax.f32 %v978_v33, %v1003_v30  ;;  %1427 = vmatpush.msrb.mxu3 %v2129_v32  ;;  %1592 = vmatpush.msrb.mxu0 %v2174_v63  ;;  %v2184_v33 = vld [vmem:[%s3341_s2 + $0x470] sm:$0xff]  ;;  %v2183_v32 = vld [vmem:[%s3341_s2 + $0x468] sm:$0xff]  ;;  %v2160_v28 = vld [vmem:[%s3341_s2 + $0x3c0] sm:$0xff] }
 0x15b   : > { %1366 = vmatpush.msra.mxu1 %v2106_v36  ;;  %1398 = vmatpush.msrb.mxu2 %v2116_v42  ;;  %v2170_v36 = vld [vmem:[%s3341_s2 + $0x408] sm:$0xff]  ;;  %v2182_v42 = vld [vmem:[%s3341_s2 + $0x460] sm:$0xff]  ;;  %v2212_v9 = vld [vmem:[%s3341_s2 + $0x538] sm:$0xff] }
 0x15c   : > { %2096 = vmatmul.msk.f32.vlgmr.msra.gmra.mxu3 %vm1061_vm1, %v1026_v45  ;;  %2114 = vmatmul.msk.f32.vlgmr.msra.gmra.mxu1 %vm1061_vm1, %v1028_v48  ;;  %v3123_v45 = vpop.f32.mrf.mxu0  ;;  %v2169_v48 = vld [vmem:[%s3341_s2 + $0x400] sm:$0xff] }
 0x15d   : > { %1399 = vmatpush.msrb.mxu2 %v2115_v49  ;;  %1428 = vmatpush.msrb.mxu3 %v2128_v50  ;;  %v2181_v49 = vld [vmem:[%s3341_s2 + $0x458] sm:$0xff] }
 0x15e   : > { %v735_v60 = vpop.f32.mrf.mxu2  ;;  %1491 = vmatpush.msrb.mxu1 %v2149_v51  ;;  %1593 = vmatpush.msrb.mxu0 %v2173_v20  ;;  %v2194_v50 = vld [vmem:[%s3341_s2 + $0x4b8] sm:$0xff]  ;;  %v2209_v20 = vld [vmem:[%s3341_s2 + $0x520] sm:$0xff] }
 0x15f   : > { %1524 = vmatpush.msra.mxu2 %v2158_v52  ;;  %v924_v44 = vpop.f32.mrf.mxu3  ;;  %1429 = vmatpush.msrb.mxu3 %v2127_v53  ;;  %v2180_v53 = vld [vmem:[%s3341_s2 + $0x450] sm:$0xff] }
 0x160   : > { %v1004_v47 = vmax.f32 %v732_v34, %v924_v44  ;;  %v3018_v12 = vpop.f32.mrf.mxu1  ;;  %1492 = vmatpush.msrb.mxu1 %v2148_v54  ;;  %1594 = vmatpush.msrb.mxu0 %v2172_v24  ;;  %v2193_v54 = vld [vmem:[%s3341_s2 + $0x4b0] sm:$0xff]  ;;  %v2192_v44 = vld [vmem:[%s3341_s2 + $0x4a8] sm:$0xff] }
 0x161   : > { %1525 = vmatpush.msra.mxu2 %v2157_v55  ;;  %1430 = vmatpush.msrb.mxu3 %v2126_v23  ;;  %v981_v25 = vmax.f32 %v2957_v26, %v3018_v12  ;;  %v2161_v26 = vld [vmem:[%s3341_s2 + $0x3c8] sm:$0xff]  ;;  %v2203_v12 = vld [vmem:[%s3341_s2 + $0x4f8] sm:$0xff] }
 0x162   : > { %v1029_v61 = vmax.f32 %v979_v56, %v1004_v47  ;;  %1493 = vmatpush.msrb.mxu1 %v2147_v58  ;;  %1595 = vmatpush.msrb.mxu0 %v2171_v38  ;;  %v2179_v23 = vld [vmem:[%s3341_s2 + $0x448] sm:$0xff]  ;;  %v2190_v47 = vld [vmem:[%s3341_s2 + $0x498] sm:$0xff] }
 0x163   : > { %1526 = vmatpush.msra.mxu2 %v2156_v59  ;;  %1431 = vmatpush.msrb.mxu3 %v2125_v37  ;;  %v2178_v59 = vld [vmem:[%s3341_s2 + $0x440] sm:$0xff]  ;;  %v2206_v38 = vld [vmem:[%s3341_s2 + $0x508] sm:$0xff] }
 0x164   : > { %2123 = vmatmul.msk.f32.vlgmr.msrb.gmra.mxu2 %vm1061_vm1, %v1029_v61  ;;  %1494 = vmatpush.msrb.mxu1 %v2146_v18  ;;  %v3162_v37 = vpop.f32.mrf.mxu0 }
 0x165   : > { %1432 = vmatpush.msrb.mxu3 %v2124_v0  ;;  %1527 = vmatpush.msra.mxu2 %v2155_v3  ;;  %v2189_v0 = vld [vmem:[%s3341_s2 + $0x490] sm:$0xff] }
 0x166   : > { %v738_v8 = vpop.f32.mrf.mxu2  ;;  %1495 = vmatpush.msrb.mxu1 %v2145_v4  ;;  %1596 = vmatpush.msrb.mxu0 %v2170_v36  ;;  %v2202_v3 = vld [vmem:[%s3341_s2 + $0x4f0] sm:$0xff]  ;;  %v2217_v36 = vld [vmem:[%s3341_s2 + $0x558] sm:$0xff] }
 0x167   : > { %1557 = vmatpush.msra.mxu3 %v2167_v5  ;;  %v927_v11 = vpop.f32.mrf.mxu3  ;;  %1528 = vmatpush.msra.mxu2 %v2154_v57 }
 0x168   : > { %v1005_v6 = vmax.f32 %v735_v60, %v927_v11  ;;  %v3065_v17 = vpop.f32.mrf.mxu1  ;;  %1496 = vmatpush.msrb.mxu1 %v2144_v7  ;;  %1597 = vmatpush.msrb.mxu0 %v2169_v48  ;;  %v2201_v7 = vld [vmem:[%s3341_s2 + $0x4e8] sm:$0xff] }
 0x169   : > { %1558 = vmatpush.msra.mxu3 %v2166_v43  ;;  %1529 = vmatpush.msra.mxu2 %v2153_v2  ;;  %v982_v51 = vmax.f32 %v3016_v1, %v3065_v17  ;;  %v2191_v1 = vld [vmem:[%s3341_s2 + $0x4a0] sm:$0xff]  ;;  %v2199_v2 = vld [vmem:[%s3341_s2 + $0x4d8] sm:$0xff] }
 0x16a   : > { %v1030_v15 = vmax.f32 %v980_v10, %v1005_v6  ;;  %1497 = vmatpush.msrb.mxu1 %v2143_v35  ;;  %v2187_v10 = vld [vmem:[%s3341_s2 + $0x480] sm:$0xff]  ;;  %v2211_v6 = vld [vmem:[%s3341_s2 + $0x530] sm:$0xff] }
 0x16b   : > { %1559 = vmatpush.msra.mxu3 %v2165_v62  ;;  %1530 = vmatpush.msra.mxu2 %v2152_v41  ;;  %v2198_v62 = vld [vmem:[%s3341_s2 + $0x4d0] sm:$0xff] }
 0x16c   : > { %2132 = vmatmul.msk.f32.vlgmr.msrb.gmra.mxu3 %vm1061_vm1, %v1030_v15  ;;  %1498 = vmatpush.msrb.mxu1 %v2142_v13  ;;  %v369_v41 = vpop.f32.mrf.mxu0  ;;  %v2210_v15 = vld [vmem:[%s3341_s2 + $0x528] sm:$0xff] }
 0x16d   : > { %1531 = vmatpush.msra.mxu2 %v2151_v16  ;;  %1560 = vmatpush.msra.mxu3 %v2164_v19  ;;  %v2196_v19 = vld [vmem:[%s3341_s2 + $0x4c0] sm:$0xff] }
 0x16e   : > { %v741_v27 = vpop.f32.mrf.mxu2  ;;  %1623 = vmatpush.msra.mxu1 %v2185_v22  ;;  %v2221_v22 = vld [vmem:[%s3341_s2 + $0x578] sm:$0xff] }
 0x16f   : > { %v930_v34 = vpop.f32.mrf.mxu3  ;;  %1561 = vmatpush.msra.mxu3 %v2163_v21  ;;  %1656 = vmatpush.msrb.mxu2 %v2194_v50  ;;  %v2208_v21 = vld [vmem:[%s3341_s2 + $0x518] sm:$0xff]  ;;  %v2229_v50 = vld [vmem:[%s3341_s2 + $0x5b0] sm:$0xff] }
 0x170   : > { %v1006_v39 = vmax.f32 %v738_v8, %v930_v34  ;;  %v552_v40 = vpop.f32.mrf.mxu1  ;;  %1624 = vmatpush.msra.mxu1 %v2184_v33  ;;  %v2200_v8 = vld [vmem:[%s3341_s2 + $0x4e0] sm:$0xff] }
 0x171   : > { %1562 = vmatpush.msra.mxu3 %v2162_v31  ;;  %1657 = vmatpush.msrb.mxu2 %v2193_v54  ;;  %v983_v18 = vmax.f32 %v3076_v14, %v552_v40  ;;  %v2197_v14 = vld [vmem:[%s3341_s2 + $0x4c8] sm:$0xff]  ;;  %v2220_v31 = vld [vmem:[%s3341_s2 + $0x570] sm:$0xff] }
 0x172   : > { %v1031_v30 = vmax.f32 %v981_v25, %v1006_v39  ;;  %1625 = vmatpush.msra.mxu1 %v2183_v32  ;;  %v2219_v39 = vld [vmem:[%s3341_s2 + $0x568] sm:$0xff] }
 0x173   : > { %1563 = vmatpush.msra.mxu3 %v2161_v26  ;;  %1658 = vmatpush.msrb.mxu2 %v2192_v44  ;;  %v2228_v54 = vld [vmem:[%s3341_s2 + $0x5a8] sm:$0xff] }
 0x174   : > { %2141 = vmatmul.msk.f32.vlgmr.msra.gmra.mxu0 %vm1061_vm1, %v1031_v30  ;;  %1626 = vmatpush.msra.mxu1 %v2182_v42  ;;  %v372_v26 = vpop.f32.mrf.mxu0  ;;  %v2205_v30 = vld [vmem:[%s3341_s2 + $0x500] sm:$0xff]  ;;  %v2230_v42 = vld [vmem:[%s3341_s2 + $0x5b8] sm:$0xff] }
 0x175   : > { %1564 = vmatpush.msra.mxu3 %v2160_v28  ;;  %1659 = vmatpush.msrb.mxu2 %v2191_v1  ;;  %v2218_v28 = vld [vmem:[%s3341_s2 + $0x560] sm:$0xff] }
 0x176   : > { %v744_v52 = vpop.f32.mrf.mxu2  ;;  %1627 = vmatpush.msra.mxu1 %v2181_v49  ;;  %1722 = vmatpush.msra.mxu0 %v2212_v9  ;;  %v2216_v49 = vld [vmem:[%s3341_s2 + $0x550] sm:$0xff] }
 0x177   : > { %v933_v55 = vpop.f32.mrf.mxu3  ;;  %1689 = vmatpush.msrb.mxu3 %v2203_v12  ;;  %1660 = vmatpush.msrb.mxu2 %v2190_v47  ;;  %v2225_v12 = vld [vmem:[%s3341_s2 + $0x590] sm:$0xff] }
 0x178   : > { %v1007_v56 = vmax.f32 %v741_v27, %v933_v55  ;;  %v555_v60 = vpop.f32.mrf.mxu1  ;;  %1628 = vmatpush.msra.mxu1 %v2180_v53  ;;  %1723 = vmatpush.msra.mxu0 %v2211_v6  ;;  %v2207_v27 = vld [vmem:[%s3341_s2 + $0x510] sm:$0xff]  ;;  %v2215_v53 = vld [vmem:[%s3341_s2 + $0x548] sm:$0xff] }
 0x179   : > { %1690 = vmatpush.msrb.mxu3 %v2202_v3  ;;  %1661 = vmatpush.msrb.mxu2 %v2189_v0  ;;  %v984_v11 = vmax.f32 %v3123_v45, %v555_v60  ;;  %v2227_v60 = vld [vmem:[%s3341_s2 + $0x5a0] sm:$0xff]  ;;  %v2224_v0 = vld [vmem:[%s3341_s2 + $0x588] sm:$0xff]  ;;  %v2247_v9 = vld [vmem:[%s3341_s2 + $0x630] sm:$0xff] }
 0x17a   : > { %v1032_v58 = vmax.f32 %v982_v51, %v1007_v56  ;;  %1629 = vmatpush.msra.mxu1 %v2179_v23  ;;  %1724 = vmatpush.msra.mxu0 %v2210_v15  ;;  %v2214_v56 = vld [vmem:[%s3341_s2 + $0x540] sm:$0xff]  ;;  %v2237_v3 = vld [vmem:[%s3341_s2 + $0x5e8] sm:$0xff] }
 0x17b   : > { %1691 = vmatpush.msrb.mxu3 %v2201_v7  ;;  %1662 = vmatpush.msrb.mxu2 %v2188_v46  ;;  %v2235_v46 = vld [vmem:[%s3341_s2 + $0x5d8] sm:$0xff]  ;;  %v2233_v6 = vld [vmem:[%s3341_s2 + $0x5c8] sm:$0xff] }
 0x17c   : > { %2150 = vmatmul.msk.f32.vlgmr.msrb.gmra.mxu1 %vm1061_vm1, %v1032_v58  ;;  %1725 = vmatpush.msra.mxu0 %v2209_v20  ;;  %v375_v44 = vpop.f32.mrf.mxu0  ;;  %v2226_v58 = vld [vmem:[%s3341_s2 + $0x598] sm:$0xff] }
 0x17d   : > { %1630 = vmatpush.msra.mxu1 %v2178_v59  ;;  %1692 = vmatpush.msrb.mxu3 %v2200_v8  ;;  %v2239_v59 = vld [vmem:[%s3341_s2 + $0x5f8] sm:$0xff] }
 0x17e   : > { %v747_v61 = vpop.f32.mrf.mxu2  ;;  %1663 = vmatpush.msrb.mxu2 %v2187_v10  ;;  %1726 = vmatpush.msra.mxu0 %v2208_v21  ;;  %v2248_v7 = vld [vmem:[%s3341_s2 + $0x638] sm:$0xff] }
 0x17f   : > { %v936_v4 = vpop.f32.mrf.mxu3  ;;  %1693 = vmatpush.msrb.mxu3 %v2199_v2  ;;  %1755 = vmatpush.msrb.mxu1 %v2221_v22  ;;  %v2234_v2 = vld [vmem:[%s3341_s2 + $0x5d0] sm:$0xff]  ;;  %v2242_v22 = vld [vmem:[%s3341_s2 + $0x608] sm:$0xff] }
 0x180   : > { %v1008_v5 = vmax.f32 %v744_v52, %v936_v4  ;;  %v558_v57 = vpop.f32.mrf.mxu1  ;;  %1727 = vmatpush.msra.mxu0 %v2207_v27 }
 0x181   : > { %1694 = vmatpush.msrb.mxu3 %v2198_v62  ;;  %v985_v24 = vmax.f32 %v3162_v37, %v558_v57  ;;  %1756 = vmatpush.msrb.mxu1 %v2220_v31  ;;  %v2238_v37 = vld [vmem:[%s3341_s2 + $0x5f0] sm:$0xff]  ;;  %v2236_v57 = vld [vmem:[%s3341_s2 + $0x5e0] sm:$0xff] }
 0x182   : > { %v1033_v43 = vmax.f32 %v983_v18, %v1008_v5  ;;  %1728 = vmatpush.msra.mxu0 %v2206_v38  ;;  %v2223_v5 = vld [vmem:[%s3341_s2 + $0x580] sm:$0xff] }
 0x183   : > { %1695 = vmatpush.msrb.mxu3 %v2197_v14  ;;  %1757 = vmatpush.msrb.mxu1 %v2219_v39  ;;  %v2244_v14 = vld [vmem:[%s3341_s2 + $0x618] sm:$0xff]  ;;  %v2241_v31 = vld [vmem:[%s3341_s2 + $0x600] sm:$0xff] }
 0x184   : > { %2159 = vmatmul.msk.f32.vlgmr.msra.gmra.mxu2 %vm1061_vm1, %v1033_v43  ;;  %1729 = vmatpush.msra.mxu0 %v2205_v30  ;;  %v378_v10 = vpop.f32.mrf.mxu0 }
 0x185   : > { %1696 = vmatpush.msrb.mxu3 %v2196_v19  ;;  %1758 = vmatpush.msrb.mxu1 %v2218_v28 }
 0x186   : > { %v750_v35 = vpop.f32.mrf.mxu2  ;;  %1788 = vmatpush.msra.mxu2 %v2230_v42 }
 0x187   : > { %v939_v17 = vpop.f32.mrf.mxu3  ;;  %1759 = vmatpush.msrb.mxu1 %v2217_v36 }
 0x188   : > { %v1009_v63 = vmax.f32 %v747_v61, %v939_v17  ;;  %v561_v13 = vpop.f32.mrf.mxu1  ;;  %1789 = vmatpush.msra.mxu2 %v2229_v50  ;;  %v2246_v17 = vld [vmem:[%s3341_s2 + $0x628] sm:$0xff] }
 0x189   : > { %v986_v45 = vmax.f32 %v369_v41, %v561_v13  ;;  %1760 = vmatpush.msrb.mxu1 %v2216_v49  ;;  %v2245_v13 = vld [vmem:[%s3341_s2 + $0x620] sm:$0xff] }
 0x18a   : > { %v1034_v16 = vmax.f32 %v984_v11, %v1009_v63  ;;  %1790 = vmatpush.msra.mxu2 %v2228_v54  ;;  %v2232_v63 = vld [vmem:[%s3341_s2 + $0x5c0] sm:$0xff] }
 0x18b   : > { %1761 = vmatpush.msrb.mxu1 %v2215_v53 }
 0x18c   : > { %2168 = vmatmul.msk.f32.vlgmr.msra.gmra.mxu3 %vm1061_vm1, %v1034_v16  ;;  %1791 = vmatpush.msra.mxu2 %v2227_v60  ;;  %v2243_v16 = vld [vmem:[%s3341_s2 + $0x610] sm:$0xff] }
 0x18d   : > { %1762 = vmatpush.msrb.mxu1 %v2214_v56  ;;  %1821 = vmatpush.msra.mxu3 %v2239_v59 }
 0x18e   : > { %v753_v25 = vpop.f32.mrf.mxu2  ;;  %1792 = vmatpush.msra.mxu2 %v2226_v58 }
 0x18f   : > { %v942_v33 = vpop.f32.mrf.mxu3  ;;  %1822 = vmatpush.msra.mxu3 %v2238_v37 }
 0x190   : > { %v1010_v34 = vmax.f32 %v750_v35, %v942_v33  ;;  %v564_v40 = vpop.f32.mrf.mxu1  ;;  %1793 = vmatpush.msra.mxu2 %v2225_v12 }
 0x191   : > { %v987_v1 = vmax.f32 %v372_v26, %v564_v40  ;;  %1823 = vmatpush.msra.mxu3 %v2237_v3 }
 0x192   : > { %v1035_v32 = vmax.f32 %v985_v24, %v1010_v34  ;;  %1794 = vmatpush.msra.mxu2 %v2224_v0  ;;  %v381_v24 = vpop.f32.mrf.mxu0 }
 0x193   : > { %1824 = vmatpush.msra.mxu3 %v2236_v57 }
 0x194   : > { %2177 = vmatmul.msk.f32.vlgmr.msrb.gmra.mxu0 %vm1061_vm1, %v1035_v32  ;;  %1795 = vmatpush.msra.mxu2 %v2223_v5 }
 0x195   : > { %1825 = vmatpush.msra.mxu3 %v2235_v46  ;;  %1854 = vmatpush.msrb.mxu0 %v2248_v7 }
 0x196   : > { %v756_v48 = vpop.f32.mrf.mxu2 }
 0x197   : > { %v945_v51 = vpop.f32.mrf.mxu3  ;;  %1826 = vmatpush.msra.mxu3 %v2234_v2  ;;  %1855 = vmatpush.msrb.mxu0 %v2247_v9 }
 0x198   : > { %v1011_v52 = vmax.f32 %v753_v25, %v945_v51  ;;  %v567_v23 = vpop.f32.mrf.mxu1 }
 0x199   : > { %v988_v8 = vmax.f32 %v375_v44, %v567_v23  ;;  %1827 = vmatpush.msra.mxu3 %v2233_v6  ;;  %1856 = vmatpush.msrb.mxu0 %v2246_v17 }
 0x19a   : > { %v1036_v55 = vmax.f32 %v986_v45, %v1011_v52  ;;  %v384_v26 = vpop.f32.mrf.mxu0 }
 0x19b   : > { %1828 = vmatpush.msra.mxu3 %v2232_v63  ;;  %1857 = vmatpush.msrb.mxu0 %v2245_v13 }
 0x19c   : > { %2186 = vmatmul.msk.f32.vlgmr.msra.gmra.mxu1 %vm1061_vm1, %v1036_v55 }
 0x19d   : > { %1858 = vmatpush.msrb.mxu0 %v2244_v14 }
 0x19e   : > { %v759_v47 = vpop.f32.mrf.mxu2 }
 0x19f   : > { %v948_v18 = vpop.f32.mrf.mxu3  ;;  %1859 = vmatpush.msrb.mxu0 %v2243_v16 }
 0x1a0   : > { %v1012_v61 = vmax.f32 %v756_v48, %v948_v18  ;;  %v570_v43 = vpop.f32.mrf.mxu1 }
 0x1a1   : > { %v989_v15 = vmax.f32 %v378_v10, %v570_v43  ;;  %1860 = vmatpush.msrb.mxu0 %v2242_v22 }
 0x1a2   : > { %v1037_v4 = vmax.f32 %v987_v1, %v1012_v61  ;;  %v387_v48 = vpop.f32.mrf.mxu0 }
 0x1a3   : > { %1861 = vmatpush.msrb.mxu0 %v2241_v31 }
 0x1a4   : > { %2195 = vmatmul.msk.f32.vlgmr.msrb.gmra.mxu2 %vm1061_vm1, %v1037_v4 }
 0x1a6   : > { %v762_v11 = vpop.f32.mrf.mxu2 }
 0x1a7   : > { %v951_v35 = vpop.f32.mrf.mxu3 }
 0x1a8   : > { %v1013_v62 = vmax.f32 %v759_v47, %v951_v35  ;;  %v573_v19 = vpop.f32.mrf.mxu1 }
 0x1a9   : > { %v990_v33 = vmax.f32 %v381_v24, %v573_v19 }
 0x1aa   : > { %v1038_v41 = vmax.f32 %v988_v8, %v1013_v62  ;;  %v1082_v59 = vpop.f32.mrf.mxu0 }
 0x1ac   : > { %2204 = vmatmul.msk.f32.vlgmr.msrb.gmra.mxu3 %vm1061_vm1, %v1038_v41 }
 0x1ae   : > { %v765_v25 = vpop.f32.mrf.mxu2 }
 0x1af   : > { %v954_v20 = vpop.f32.mrf.mxu3 }
 0x1b0   : > { %v1014_v21 = vmax.f32 %v762_v11, %v954_v20  ;;  %v576_v39 = vpop.f32.mrf.mxu1 }
 0x1b1   : > { %v991_v30 = vmax.f32 %v384_v26, %v576_v39 }
 0x1b2   : > { %v1039_v27 = vmax.f32 %v989_v15, %v1014_v21  ;;  %v1203_v61 = vpop.f32.mrf.mxu0 }
 0x1b4   : > { %2213 = vmatmul.msk.f32.vlgmr.msra.gmra.mxu0 %vm1061_vm1, %v1039_v27 }
 0x1b6   : > { %v768_v32 = vpop.f32.mrf.mxu2 }
 0x1b7   : > { %v957_v34 = vpop.f32.mrf.mxu3 }
 0x1b8   : > { %v1015_v38 = vmax.f32 %v765_v25, %v957_v34  ;;  %v579_v45 = vpop.f32.mrf.mxu1 }
 0x1b9   : > { %v992_v50 = vmax.f32 %v387_v48, %v579_v45 }
 0x1ba   : > { %v1040_v40 = vmax.f32 %v990_v33, %v1015_v38 }
 0x1bc   : > { %2222 = vmatmul.msk.f32.vlgmr.msrb.gmra.mxu1 %vm1061_vm1, %v1040_v40 }
 0x1be   : > { %v771_v49 = vpop.f32.mrf.mxu2 }
 0x1bf   : > { %v960_v28 = vpop.f32.mrf.mxu3 }
 0x1c0   : > { %v1016_v36 = vmax.f32 %v768_v32, %v960_v28  ;;  %v582_v54 = vpop.f32.mrf.mxu1 }
 0x1c1   : > { %v993_v60 = vmax.f32 %v2598_v29, %v582_v54 }
 0x1c2   : > { %v1041_v42 = vmax.f32 %v991_v30, %v1016_v36  ;;  %v2268_v30 = vld [vmem:[%s3342_s3] ss:$0 sm:$0xff] }
 0x1c4   : > { %2231 = vmatmul.msk.f32.vlgmr.msra.gmra.mxu2 %vm1061_vm1, %v1041_v42 }
 0x1c6   : > { %v774_v55 = vpop.f32.mrf.mxu2 }
 0x1c7   : > { %v963_v51 = vpop.f32.mrf.mxu3 }
 0x1c8   : > { %v1017_v52 = vmax.f32 %v771_v49, %v963_v51  ;;  %v1105_v58 = vpop.f32.mrf.mxu1 }
 0x1c9   : > { %v1106_v47 = vadd.f32 %v1105_v58, %v1082_v59 }
 0x1ca   : > { %v1042_v53 = vmax.f32 %v992_v50, %v1017_v52 }
 0x1cc   : > { %2240 = vmatmul.msk.f32.vlgmr.msra.gmra.mxu3 %vm1061_vm1, %v1042_v53 }
 0x1ce   : > { %v1137_v1 = vpop.f32.mrf.mxu2 }
 0x1cf   : > { %v966_v56 = vpop.f32.mrf.mxu3  ;;  %v1140_v37 = vadd.f32 %v1137_v1, %v1106_v47 }
 0x1d0   : > { %v1018_v23 = vmax.f32 %v774_v55, %v966_v56  ;;  %v1236_v3 = vpop.f32.mrf.mxu1 }
 0x1d1   : > { %v1335_v29 = vpop.f32.mrf.mxu0 }
 0x1d2   : > { %v1043_v44 = vmax.f32 %v993_v60, %v1018_v23 }
 0x1d4   : > { %2249 = vmatmul.msk.f32.vlgmr.msrb.gmra.mxu0 %vm1061_vm1, %v1043_v44 }
 0x1d6   : > { %v1269_v5 = vpop.f32.mrf.mxu2 }
 0x1d7   : > { %v1170_v12 = vpop.f32.mrf.mxu3 }
 0x1d8   : > { %v1173_v18 = vadd.f32 %v1170_v12, %v1140_v37 }
 0x1d9   : > { %v1368_v10 = vpop.f32.mrf.mxu1 }
 0x1da   : > { %v1206_v0 = vadd.f32 %v1203_v61, %v1173_v18 }
 0x1dc   : > { %v1239_v4 = vadd.f32 %v1236_v3, %v1206_v0 }
 0x1de   : > { %v1272_v57 = vadd.f32 %v1269_v5, %v1239_v4 }
 0x1df   : > { %v1302_v46 = vpop.f32.mrf.mxu3 }
 0x1e0   : > { %v1305_v7 = vadd.f32 %v1302_v46, %v1272_v57 }
 0x1e2   : > { %v1338_v43 = vadd.f32 %v1335_v29, %v1305_v7 }
 0x1e4   : > { %v1371_v2 = vadd.f32 %v1368_v10, %v1338_v43 }
 0x1e7   : > { %v1401_v8 = vpop.f32.mrf.mxu2 }
 0x1e8   : > { %v1404_v11 = vadd.f32 %v1401_v8, %v1371_v2 }
 0x1ef   : > { %v1434_v9 = vpop.f32.mrf.mxu3 }
 0x1f0   : > { %v1437_v35 = vadd.f32 %v1434_v9, %v1404_v11 }
 0x1f1   : > { %v1467_v62 = vpop.f32.mrf.mxu0 }
 0x1f2   : > { %v1470_v17 = vadd.f32 %v1467_v62, %v1437_v35 }
 0x1f9   : > { %v1500_v6 = vpop.f32.mrf.mxu1 }
 0x1fa   : > { %v1503_v63 = vadd.f32 %v1500_v6, %v1470_v17 }
 0x207   : > { %v1533_v41 = vpop.f32.mrf.mxu2 }
 0x208   : > { %v1536_v14 = vadd.f32 %v1533_v41, %v1503_v63 }
 0x20f   : > { %v1566_v13 = vpop.f32.mrf.mxu3 }
 0x210   : > { %v1569_v15 = vadd.f32 %v1566_v13, %v1536_v14 }
 0x211   : > { %v1599_v16 = vpop.f32.mrf.mxu0 }
 0x212   : > { %v1602_v20 = vadd.f32 %v1599_v16, %v1569_v15 }
 0x219   : > { %v1632_v19 = vpop.f32.mrf.mxu1 }
 0x21a   : > { %v1635_v22 = vadd.f32 %v1632_v19, %v1602_v20 }
 0x227   : > { %v1665_v21 = vpop.f32.mrf.mxu2 }
 0x228   : > { %v1668_v25 = vadd.f32 %v1665_v21, %v1635_v22 }
 0x22f   : > { %v1698_v24 = vpop.f32.mrf.mxu3 }
 0x230   : > { %v1701_v27 = vadd.f32 %v1698_v24, %v1668_v25 }
 0x231   : > { %v1731_v31 = vpop.f32.mrf.mxu0 }
 0x232   : > { %v1734_v34 = vadd.f32 %v1731_v31, %v1701_v27 }
 0x239   : > { %v1764_v33 = vpop.f32.mrf.mxu1 }
 0x23a   : > { %v1767_v39 = vadd.f32 %v1764_v33, %v1734_v34 }
 0x247   : > { %v1797_v38 = vpop.f32.mrf.mxu2 }
 0x248   : > { %v1800_v40 = vadd.f32 %v1797_v38, %v1767_v39 }
 0x24f   : > { %v1830_v26 = vpop.f32.mrf.mxu3 }
 0x250   : > { %v1833_v32 = vadd.f32 %v1830_v26, %v1800_v40 }
 0x251   : > { %v1863_v28 = vpop.f32.mrf.mxu0 }
 0x252   : > { %v1866_v36 = vadd.f32 %v1863_v28, %v1833_v32 }
 0x254   : > { %v1871_v42 = vadd.f32 %v2268_v30, %v1866_v36 }
 0x256   : > { %1872 = vst [vmem:[%s195_s29] sm:$0xff] %v1871_v42 }
 0x257 PF: > { %s14_s15 = sadd.s32 1, %s2275_s15  }
 0x258   : > { %p11_p4 = scmp.ge.s32.totalorder %s14_s15, 4  }
 0x25a   :  { %13 = sbr.rel (!%p11_p4) target bundleno = 1 (0x1), region = 90 }

</bundles_post_ra>
